<compile_context>
chip_gen: v7x
topology: tpu7x:2x2x1
jax: 0.10.0
libtpu: 0.0.40
codegen_flags: <defaults>
</compile_context>

<pallas_src>
import functools

import jax
import jax.numpy as jnp
from jax.experimental import pallas as pl
from jax.experimental.pallas import tpu as pltpu


# --------------------------------------------------------------------------- #
# small helpers                                                               #
# --------------------------------------------------------------------------- #
def _round_up(x, m):
    return ((x + m - 1) // m) * m


def _sublane_pad(n, itemsize):
    # second-minor tile: 8 rows for 32-bit, 16 for 16-bit, 32 for 8-bit dtypes
    return _round_up(n, max(8, 32 // max(1, itemsize)))


def _lane_pad(n):
    return _round_up(n, 128)


def _vmem_capacity_bytes():
    try:
        return int(pltpu.get_tpu_info().vmem_capacity_bytes)
    except Exception:
        return 64 * 2 ** 20          # conservative (v7x-sized) fallback


def _vmem_block_bytes(th, W, Cin, Co, Cop, x_sz, o_sz, c_sz):
    """Honest VMEM estimate: 2 pipeline buffers per operand, incl. padding."""
    x_blk = Cin * _sublane_pad(th, x_sz) * _lane_pad(W) * x_sz
    o_blk = Co * _sublane_pad(2 * th, o_sz) * _lane_pad(2 * W) * o_sz
    w_blk = _sublane_pad(4 * Cop, c_sz) * _lane_pad(Cin) * c_sz
    b_blk = _sublane_pad(Co, 4) * 128 * 4          # (Co, 1) is lane-padded to 128
    e_blk = _sublane_pad(W, 4) * _lane_pad(2 * W) * 4
    return 2 * (x_blk + o_blk + w_blk + b_blk + 2 * e_blk)


def _pick_rows_per_step(N, H, W, Cin, Co, Cop, x_sz, o_sz, c_sz):
    """Input rows per grid step, derived from VMEM capacity and grid-step count."""
    row_tile = 8 if x_sz >= 4 else 16
    cands = [d for d in range(1, H + 1)
             if H % d == 0 and (d % row_tile == 0 or d == H)]
    budget = int(0.45 * _vmem_capacity_bytes())
    fits = [d for d in cands
            if _vmem_block_bytes(d, W, Cin, Co, Cop, x_sz, o_sz, c_sz) <= budget]
    if not fits:
        fits = [min(cands)]
    # keep >= ~8 grid steps so v7x's two TensorCores both get work and the
    # x / out DMAs overlap with compute (no effect on single-TC v5e/v6e).
    max_th = max(1, (N * H) // 8)
    capped = [d for d in fits if d <= max_th]
    return max(capped) if capped else min(fits)


# --------------------------------------------------------------------------- #
# fused kernel: matmul + 2x2 pixel-shuffle, written straight to NCHW           #
# --------------------------------------------------------------------------- #
def _upsample_fused_kernel(w_ref, b_ref, e0_ref, e1_ref, x_ref, o_ref):
    # w_ref : (4*Cop, Cin)   weight slab, rows ordered (kx, ky, co), compute dtype
    # b_ref : (Co, 1)        f32 bias column
    # e0/e1 : (W, 2W)        f32 0/1 interleave matrices (even / odd out columns)
    # x_ref : (Cin, th, W)   native-dtype input rows (cast in-kernel)
    # o_ref : (Co, 2*th, 2W) final NCHW output rows
    cop = w_ref.shape[0] // 4
    co = o_ref.shape[0]
    th = x_ref.shape[1]
    cdt = w_ref.dtype

    wmat = w_ref[...]
    e0 = e0_ref[...]
    e1 = e1_ref[...]
    b = b_ref[...]

    def emit_rows(i):
        xi = x_ref[:, i, :].astype(cdt)                                # (Cin, W)
        p = jnp.dot(wmat, xi, preferred_element_type=jnp.float32)      # (4cop, W)
        # kx lane interleave on the MXU (exact, E is 0/1): the kx=0 half of p
        # lands on even output columns, the kx=1 half on odd output columns.
        s = (jnp.dot(p[:2 * cop, :], e0, preferred_element_type=jnp.float32)
             + jnp.dot(p[2 * cop:, :], e1, preferred_element_type=jnp.float32))
        # s: (2*cop, 2W), rows ordered (ky, co); ky selects the output row.
        o_ref[:, 2 * i, :] = (s[0:co, :] + b).astype(o_ref.dtype)
        o_ref[:, 2 * i + 1, :] = (s[cop:cop + co, :] + b).astype(o_ref.dtype)

    if th <= 16:
        for i in range(th):            # static unroll: LLO scheduler visibility
            emit_rows(i)
    else:
        pl.loop(0, th)(emit_rows)


@functools.partial(jax.jit, static_argnames=("compute_dtype", "out_dtype",
                                             "rows_per_step"))
def _upsample_fused(x_nchw, weight, bias, *, compute_dtype, out_dtype,
                    rows_per_step):
    N, Cin, H, W = x_nchw.shape
    Co = weight.shape[1]

    x_sz = jnp.dtype(x_nchw.dtype).itemsize
    o_sz = jnp.dtype(out_dtype).itemsize
    c_sz = jnp.dtype(compute_dtype).itemsize

    # per-(kx,ky) channel group padded to the bf16 sublane packing (16)
    Cop = _round_up(Co, 16)

    th = (rows_per_step if rows_per_step is not None else
          _pick_rows_per_step(N, H, W, Cin, Co, Cop, x_sz, o_sz, c_sz))
    assert H % th == 0, (H, th)

    # ---- weight slab: rows ordered (kx, ky, co_padded) ----------------------
    w_perm = jnp.transpose(weight, (3, 2, 1, 0))            # (kx, ky, co, ci)
    if Cop != Co:
        w_perm = jnp.pad(w_perm, ((0, 0), (0, 0), (0, Cop - Co), (0, 0)))
    w_mat = w_perm.reshape(4 * Cop, Cin).astype(compute_dtype)
    b_col = bias.reshape(Co, 1).astype(jnp.float32)

    # ---- constant 0/1 pixel-shuffle (column interleave) matrices ------------
    j = jnp.arange(W, dtype=jnp.int32)[:, None]
    wv = jnp.arange(2 * W, dtype=jnp.int32)[None, :]
    e0 = (wv == 2 * j).astype(jnp.float32)        # -> even output columns (kx=0)
    e1 = (wv == 2 * j + 1).astype(jnp.float32)    # -> odd  output columns (kx=1)

    grid = (N, H // th)

    est = _vmem_block_bytes(th, W, Cin, Co, Cop, x_sz, o_sz, c_sz)
    cap = _vmem_capacity_bytes()
    vmem_limit = int(min(max(2 * est, 32 * 2 ** 20), 0.9 * cap))
    vmem_limit = int(max(vmem_limit, min(est + (2 << 20), cap)))

    cost = pl.CostEstimate(
        flops=int(2 * N * H * W * Cin * 4 * Cop              # main matmul
                  + 2 * N * H * (2 * Cop) * W * (2 * W) * 2),  # interleave matmuls
        transcendentals=0,
        bytes_accessed=int(N * Cin * H * W * x_sz
                           + N * Co * 4 * H * W * o_sz
                           + 4 * Cop * Cin * c_sz + 4 * W * W * 4 * 2 + Co * 4),
    )

    return pl.pallas_call(
        _upsample_fused_kernel,
        out_shape=jax.ShapeDtypeStruct((N, Co, 2 * H, 2 * W), out_dtype),
        grid_spec=pltpu.PrefetchScalarGridSpec(
            num_scalar_prefetch=0,
            grid=grid,
            in_specs=[
                # grid-invariant slabs (constant index_map -> DMA'd once).
                # TODO(synk): pipeline_mode=pl.Buffered(1) would drop their
                # second pipeline buffer; kept at default for portability.
                pl.BlockSpec((4 * Cop, Cin), lambda n, r: (0, 0)),
                pl.BlockSpec((Co, 1), lambda n, r: (0, 0)),
                pl.BlockSpec((W, 2 * W), lambda n, r: (0, 0)),
                pl.BlockSpec((W, 2 * W), lambda n, r: (0, 0)),
                # streamed input rows, native dtype (cast happens in-kernel)
                pl.BlockSpec((None, Cin, th, W), lambda n, r: (n, 0, r, 0)),
            ],
            out_specs=pl.BlockSpec((None, Co, 2 * th, 2 * W),
                                   lambda n, r: (n, 0, r, 0)),
        ),
        compiler_params=pltpu.CompilerParams(
            dimension_semantics=("parallel", "parallel"),
            vmem_limit_bytes=vmem_limit),
        cost_estimate=cost,
    )(w_mat, b_col, e0, e1, x_nchw)


# --------------------------------------------------------------------------- #
# fallback: previous (known-good) two-stage kernel: matmul + XLA pixel-shuffle #
# --------------------------------------------------------------------------- #
def _upsample_matmul_kernel(w_ref, b_ref, x_ref, o_ref):
    acc = jnp.dot(w_ref[...], x_ref[...].astype(w_ref.dtype),
                  preferred_element_type=jnp.float32)
    o_ref[...] = (acc + b_ref[...]).astype(o_ref.dtype)


@functools.partial(jax.jit, static_argnames=("compute_dtype", "out_dtype"))
def _upsample_fallback(x_nchw, weight, bias, *, compute_dtype, out_dtype):
    N, Cin, H, W = x_nchw.shape
    Co = weight.shape[1]
    L = H * W

    tl = min(_round_up(L, 128), 2048)
    n_t = max(1, -(-L // tl))
    tl = _round_up(-(-L // n_t), 128)          # bound spatial padding waste
    L_pad = _round_up(L, tl)

    x_flat = x_nchw.reshape(N, Cin, L)
    if L_pad != L:
        x_flat = jnp.pad(x_flat, ((0, 0), (0, 0), (0, L_pad - L)))

    Nd = 4 * Co
    Nd_pad = _round_up(Nd, 16)
    w_mat = jnp.transpose(weight, (2, 3, 1, 0)).reshape(Nd, Cin)
    b_col = jnp.tile(bias, (4,)).reshape(Nd, 1).astype(jnp.float32)
    if Nd_pad != Nd:
        w_mat = jnp.pad(w_mat, ((0, Nd_pad - Nd), (0, 0)))
        b_col = jnp.pad(b_col, ((0, Nd_pad - Nd), (0, 0)))
    w_c = w_mat.astype(compute_dtype)

    grid = (N, L_pad // tl)
    y_full = pl.pallas_call(
        _upsample_matmul_kernel,
        out_shape=jax.ShapeDtypeStruct((N, Nd_pad, L_pad), out_dtype),
        grid_spec=pltpu.PrefetchScalarGridSpec(
            num_scalar_prefetch=0,
            grid=grid,
            in_specs=[
                pl.BlockSpec((Nd_pad, Cin), lambda n, l: (0, 0)),
                pl.BlockSpec((Nd_pad, 1), lambda n, l: (0, 0)),
                pl.BlockSpec((None, Cin, tl), lambda n, l: (n, 0, l)),
            ],
            out_specs=pl.BlockSpec((None, Nd_pad, tl), lambda n, l: (n, 0, l)),
        ),
        compiler_params=pltpu.CompilerParams(
            dimension_semantics=("parallel", "parallel"),
            vmem_limit_bytes=int(min(0.9 * _vmem_capacity_bytes(), 96 * 2 ** 20))),
    )(w_c, b_col, x_flat)

    y = y_full[:, :Nd, :L].reshape(N, 2, 2, Co, H, W)
    y = jnp.transpose(y, (0, 3, 4, 1, 5, 2)).reshape(N, Co, 2 * H, 2 * W)
    return y


# --------------------------------------------------------------------------- #
# public entry point                                                          #
# --------------------------------------------------------------------------- #
_FUSED_FAILED = False


def upsample_forward(x_nchw, weight, bias, *, compute_dtype=jnp.bfloat16,
                     out_dtype=None, rows_per_step=None):
    """ConvTranspose2d(kernel_size=2, stride=2) forward.

    x_nchw: (N, Cin, H, W); weight: (Cin, Cout, 2, 2); bias: (Cout,)
    returns (N, Cout, 2H, 2W) in `out_dtype` (default: dtype of x).
    """
    global _FUSED_FAILED
    out_dt = jnp.dtype(x_nchw.dtype) if out_dtype is None else jnp.dtype(out_dtype)
    c_dt = jnp.dtype(compute_dtype)
    if not _FUSED_FAILED:
        try:
            return _upsample_fused(x_nchw, weight, bias, compute_dtype=c_dt,
                                   out_dtype=out_dt, rows_per_step=rows_per_step)
        except Exception:
            # Fused path failed to lower on this backend: fall back to the
            # two-stage kernel so the forward pass still runs.
            _FUSED_FAILED = True
    return _upsample_fallback(x_nchw, weight, bias, compute_dtype=c_dt,
                              out_dtype=out_dt)


class UpsampleClassPallas:
    """JAX/Pallas mirror of UpsampleClass with upsample = ConvTranspose2d(k=2, s=2)."""

    def __init__(self, in_channels, channel_div=None, out_channels=None, key=None):
        assert channel_div is not None or out_channels is not None
        self.in_channels = in_channels
        self.channel_div = channel_div
        self.out_ch = (out_channels if out_channels is not None
                       else in_channels // channel_div)
        if key is None:
            key = jax.random.PRNGKey(0)
        kw, kb = jax.random.split(key)
        fan_in = in_channels * 2 * 2
        bound = 1.0 / (fan_in ** 0.5)
        self.weight = jax.random.uniform(
            kw, (in_channels, self.out_ch, 2, 2), jnp.float32, -bound, bound)
        self.bias = jax.random.uniform(
            kb, (self.out_ch,), jnp.float32, -bound, bound)

    @property
    def out_channels(self):
        return self.out_ch

    def __call__(self, x_nchw, *, compute_dtype=jnp.bfloat16, out_dtype=None):
        return upsample_forward(x_nchw, self.weight, self.bias,
                                compute_dtype=compute_dtype, out_dtype=out_dtype)


def _reference_forward(x_nchw, weight, bias):
    # Pure-JAX reference for ConvTranspose2d(k=2, s=2).
    N, Cin, H, W = x_nchw.shape
    Co = weight.shape[1]
    y = jnp.einsum("ncij,cokl->noikjl", x_nchw, weight)
    y = y.reshape(N, Co, 2 * H, 2 * W) + bias[None, :, None, None]
    return y


if __name__ == "__main__":
    key = jax.random.PRNGKey(0)
    k_x, k_p, k_x2, k_p2 = jax.random.split(key, 4)

    # Shapes consistent with the module: batch=2, in_channels=4, spatial 16x16,
    # channel_div=2 -> out_channels=2, output spatial 32x32.
    N, Cin, H, W = 2, 4, 16, 16
    x = jax.random.normal(k_x, (N, Cin, H, W), jnp.float32)

    mod = UpsampleClassPallas(in_channels=Cin, channel_div=2, key=k_p)
    y_ref = _reference_forward(x, mod.weight, mod.bias)

    # Exact-precision path (f32 compute) -- tight correctness check.
    y_f32 = jax.block_until_ready(
        upsample_forward(x, mod.weight, mod.bias, compute_dtype=jnp.float32))
    assert y_f32.shape == (N, mod.out_channels, 2 * H, 2 * W), y_f32.shape
    assert jnp.allclose(y_f32, y_ref, atol=1e-5, rtol=1e-5), float(
        jnp.max(jnp.abs(y_f32 - y_ref)))

    # Optimized default path (bf16 operands on the MXU, f32 accumulation).
    y_bf = jax.block_until_ready(mod(x))
    assert y_bf.shape == y_ref.shape, y_bf.shape
    assert jnp.allclose(y_bf, y_ref, atol=5e-2, rtol=5e-2), float(
        jnp.max(jnp.abs(y_bf - y_ref)))

    # Second config: explicit out_channels, different spatial size, f32 exact.
    mod2 = UpsampleClassPallas(in_channels=8, out_channels=6, key=k_p2)
    x2 = jax.random.normal(k_x2, (2, 8, 8, 8), jnp.float32)
    y2_ref = _reference_forward(x2, mod2.weight, mod2.bias)
    y2 = jax.block_until_ready(
        upsample_forward(x2, mod2.weight, mod2.bias, compute_dtype=jnp.float32))
    assert y2.shape == (2, 6, 16, 16), y2.shape
    assert jnp.allclose(y2, y2_ref, atol=1e-5, rtol=1e-5), float(
        jnp.max(jnp.abs(y2 - y2_ref)))

    print("KERNEL_OK")
</pallas_src>

<mosaic_0001>
module attributes {stable_mosaic.version = 11 : i64} {
  func.func @_upsample_fused_kernel(%arg0: i32, %arg1: i32, %arg2: memref<64x4xf32, #tpu.memory_space<vmem>>, %arg3: memref<2x1xf32, #tpu.memory_space<vmem>>, %arg4: memref<16x32xf32, #tpu.memory_space<vmem>>, %arg5: memref<16x32xf32, #tpu.memory_space<vmem>>, %arg6: memref<1x4x8x16xf32, #tpu.memory_space<vmem>>, %arg7: memref<1x2x16x32xf32, #tpu.memory_space<vmem>>) attributes {dimension_semantics = [#tpu.dimension_semantics<parallel>, #tpu.dimension_semantics<parallel>], iteration_bounds = array<i64: 2, 2>, scalar_prefetch = 0 : i64, scratch_operands = 0 : i64, tpu.core_type = #tpu.core_type<tc>, window_params = [{pipeline_mode = #tpu.pipeline_mode<synchronous>, transform_indices = @transform_0, window_bounds = array<i64: 64, 4>}, {pipeline_mode = #tpu.pipeline_mode<synchronous>, transform_indices = @transform_1, window_bounds = array<i64: 2, 1>}, {pipeline_mode = #tpu.pipeline_mode<synchronous>, transform_indices = @transform_2, window_bounds = array<i64: 16, 32>}, {pipeline_mode = #tpu.pipeline_mode<synchronous>, transform_indices = @transform_3, window_bounds = array<i64: 16, 32>}, {transform_indices = @transform_4, window_bounds = array<i64: 1, 4, 8, 16>}, {transform_indices = @transform_5, window_bounds = array<i64: 1, 2, 16, 32>}]} {
    %c0 = arith.constant 0 : index
    %c0_0 = arith.constant 0 : index
    %0 = vector.load %arg2[%c0, %c0_0] : memref<64x4xf32, #tpu.memory_space<vmem>>, vector<64x4xf32>
    %c0_1 = arith.constant 0 : index
    %c0_2 = arith.constant 0 : index
    %1 = vector.load %arg4[%c0_1, %c0_2] : memref<16x32xf32, #tpu.memory_space<vmem>>, vector<16x32xf32>
    %c0_3 = arith.constant 0 : index
    %c0_4 = arith.constant 0 : index
    %2 = vector.load %arg5[%c0_3, %c0_4] : memref<16x32xf32, #tpu.memory_space<vmem>>, vector<16x32xf32>
    %c0_5 = arith.constant 0 : index
    %c0_6 = arith.constant 0 : index
    %3 = vector.load %arg3[%c0_5, %c0_6] : memref<2x1xf32, #tpu.memory_space<vmem>>, vector<2x1xf32>
    %c0_7 = arith.constant 0 : index
    %c0_8 = arith.constant 0 : index
    %c0_9 = arith.constant 0 : index
    %c0_10 = arith.constant 0 : index
    %4 = vector.load %arg6[%c0_7, %c0_8, %c0_9, %c0_10] : memref<1x4x8x16xf32, #tpu.memory_space<vmem>>, vector<1x4x1x16xf32>
    %5 = vector.shape_cast %4 : vector<1x4x1x16xf32> to vector<4x16xf32>
    %cst = arith.constant dense<0.000000e+00> : vector<64x16xf32>
    %6 = tpu.matmul %0, %5, %cst {dimension_numbers = #tpu.dot_dimension_numbers<[1], [0], [0], [1], [0, 0, 1, 1], [], []>} : vector<64x4xf32>, vector<4x16xf32>, vector<64x16xf32> -> vector<64x16xf32>
    %7 = vector.extract_strided_slice %6 {offsets = [0, 0], sizes = [32, 16], strides = [1, 1]} : vector<64x16xf32> to vector<32x16xf32>
    %cst_11 = arith.constant dense<0.000000e+00> : vector<32x32xf32>
    %8 = tpu.matmul %7, %1, %cst_11 {dimension_numbers = #tpu.dot_dimension_numbers<[1], [0], [0], [1], [0, 0, 1, 1], [], []>} : vector<32x16xf32>, vector<16x32xf32>, vector<32x32xf32> -> vector<32x32xf32>
    %9 = vector.extract_strided_slice %6 {offsets = [32, 0], sizes = [32, 16], strides = [1, 1]} : vector<64x16xf32> to vector<32x16xf32>
    %cst_12 = arith.constant dense<0.000000e+00> : vector<32x32xf32>
    %10 = tpu.matmul %9, %2, %cst_12 {dimension_numbers = #tpu.dot_dimension_numbers<[1], [0], [0], [1], [0, 0, 1, 1], [], []>} : vector<32x16xf32>, vector<16x32xf32>, vector<32x32xf32> -> vector<32x32xf32>
    %11 = arith.addf %8, %10 : vector<32x32xf32>
    %12 = vector.extract_strided_slice %11 {offsets = [0, 0], sizes = [2, 32], strides = [1, 1]} : vector<32x32xf32> to vector<2x32xf32>
    %13 = vector.broadcast %3 : vector<2x1xf32> to vector<2x32xf32>
    %14 = arith.addf %12, %13 : vector<2x32xf32>
    %c0_13 = arith.constant 0 : index
    %c0_14 = arith.constant 0 : index
    %c0_15 = arith.constant 0 : index
    %c0_16 = arith.constant 0 : index
    %15 = vector.load %arg7[%c0_13, %c0_14, %c0_15, %c0_16] : memref<1x2x16x32xf32, #tpu.memory_space<vmem>>, vector<1x2x1x32xf32>
    %16 = vector.shape_cast %15 : vector<1x2x1x32xf32> to vector<2x32xf32>
    %17 = vector.shape_cast %14 : vector<2x32xf32> to vector<1x2x1x32xf32>
    tpu.vector_store %arg7[%c0_13, %c0_14, %c0_15, %c0_16], %17 {strides = array<i32>} : memref<1x2x16x32xf32, #tpu.memory_space<vmem>>, vector<1x2x1x32xf32>,
    %18 = vector.extract_strided_slice %11 {offsets = [16, 0], sizes = [2, 32], strides = [1, 1]} : vector<32x32xf32> to vector<2x32xf32>
    %19 = vector.broadcast %3 : vector<2x1xf32> to vector<2x32xf32>
    %20 = arith.addf %18, %19 : vector<2x32xf32>
    %c0_17 = arith.constant 0 : index
    %c0_18 = arith.constant 0 : index
    %c1 = arith.constant 1 : index
    %c0_19 = arith.constant 0 : index
    %21 = vector.load %arg7[%c0_17, %c0_18, %c1, %c0_19] : memref<1x2x16x32xf32, #tpu.memory_space<vmem>>, vector<1x2x1x32xf32>
    %22 = vector.shape_cast %21 : vector<1x2x1x32xf32> to vector<2x32xf32>
    %23 = vector.shape_cast %20 : vector<2x32xf32> to vector<1x2x1x32xf32>
    tpu.vector_store %arg7[%c0_17, %c0_18, %c1, %c0_19], %23 {strides = array<i32>} : memref<1x2x16x32xf32, #tpu.memory_space<vmem>>, vector<1x2x1x32xf32>,
    %c0_20 = arith.constant 0 : index
    %c0_21 = arith.constant 0 : index
    %c1_22 = arith.constant 1 : index
    %c0_23 = arith.constant 0 : index
    %24 = vector.load %arg6[%c0_20, %c0_21, %c1_22, %c0_23] : memref<1x4x8x16xf32, #tpu.memory_space<vmem>>, vector<1x4x1x16xf32>
    %25 = vector.shape_cast %24 : vector<1x4x1x16xf32> to vector<4x16xf32>
    %cst_24 = arith.constant dense<0.000000e+00> : vector<64x16xf32>
    %26 = tpu.matmul %0, %25, %cst_24 {dimension_numbers = #tpu.dot_dimension_numbers<[1], [0], [0], [1], [0, 0, 1, 1], [], []>} : vector<64x4xf32>, vector<4x16xf32>, vector<64x16xf32> -> vector<64x16xf32>
    %27 = vector.extract_strided_slice %26 {offsets = [0, 0], sizes = [32, 16], strides = [1, 1]} : vector<64x16xf32> to vector<32x16xf32>
    %cst_25 = arith.constant dense<0.000000e+00> : vector<32x32xf32>
    %28 = tpu.matmul %27, %1, %cst_25 {dimension_numbers = #tpu.dot_dimension_numbers<[1], [0], [0], [1], [0, 0, 1, 1], [], []>} : vector<32x16xf32>, vector<16x32xf32>, vector<32x32xf32> -> vector<32x32xf32>
    %29 = vector.extract_strided_slice %26 {offsets = [32, 0], sizes = [32, 16], strides = [1, 1]} : vector<64x16xf32> to vector<32x16xf32>
    %cst_26 = arith.constant dense<0.000000e+00> : vector<32x32xf32>
    %30 = tpu.matmul %29, %2, %cst_26 {dimension_numbers = #tpu.dot_dimension_numbers<[1], [0], [0], [1], [0, 0, 1, 1], [], []>} : vector<32x16xf32>, vector<16x32xf32>, vector<32x32xf32> -> vector<32x32xf32>
    %31 = arith.addf %28, %30 : vector<32x32xf32>
    %32 = vector.extract_strided_slice %31 {offsets = [0, 0], sizes = [2, 32], strides = [1, 1]} : vector<32x32xf32> to vector<2x32xf32>
    %33 = vector.broadcast %3 : vector<2x1xf32> to vector<2x32xf32>
    %34 = arith.addf %32, %33 : vector<2x32xf32>
    %c0_27 = arith.constant 0 : index
    %c0_28 = arith.constant 0 : index
    %c2 = arith.constant 2 : index
    %c0_29 = arith.constant 0 : index
    %35 = vector.load %arg7[%c0_27, %c0_28, %c2, %c0_29] : memref<1x2x16x32xf32, #tpu.memory_space<vmem>>, vector<1x2x1x32xf32>
    %36 = vector.shape_cast %35 : vector<1x2x1x32xf32> to vector<2x32xf32>
    %37 = vector.shape_cast %34 : vector<2x32xf32> to vector<1x2x1x32xf32>
    tpu.vector_store %arg7[%c0_27, %c0_28, %c2, %c0_29], %37 {strides = array<i32>} : memref<1x2x16x32xf32, #tpu.memory_space<vmem>>, vector<1x2x1x32xf32>,
    %38 = vector.extract_strided_slice %31 {offsets = [16, 0], sizes = [2, 32], strides = [1, 1]} : vector<32x32xf32> to vector<2x32xf32>
    %39 = vector.broadcast %3 : vector<2x1xf32> to vector<2x32xf32>
    %40 = arith.addf %38, %39 : vector<2x32xf32>
    %c0_30 = arith.constant 0 : index
    %c0_31 = arith.constant 0 : index
    %c3 = arith.constant 3 : index
    %c0_32 = arith.constant 0 : index
    %41 = vector.load %arg7[%c0_30, %c0_31, %c3, %c0_32] : memref<1x2x16x32xf32, #tpu.memory_space<vmem>>, vector<1x2x1x32xf32>
    %42 = vector.shape_cast %41 : vector<1x2x1x32xf32> to vector<2x32xf32>
    %43 = vector.shape_cast %40 : vector<2x32xf32> to vector<1x2x1x32xf32>
    tpu.vector_store %arg7[%c0_30, %c0_31, %c3, %c0_32], %43 {strides = array<i32>} : memref<1x2x16x32xf32, #tpu.memory_space<vmem>>, vector<1x2x1x32xf32>,
    %c0_33 = arith.constant 0 : index
    %c0_34 = arith.constant 0 : index
    %c2_35 = arith.constant 2 : index
    %c0_36 = arith.constant 0 : index
    %44 = vector.load %arg6[%c0_33, %c0_34, %c2_35, %c0_36] : memref<1x4x8x16xf32, #tpu.memory_space<vmem>>, vector<1x4x1x16xf32>
    %45 = vector.shape_cast %44 : vector<1x4x1x16xf32> to vector<4x16xf32>
    %cst_37 = arith.constant dense<0.000000e+00> : vector<64x16xf32>
    %46 = tpu.matmul %0, %45, %cst_37 {dimension_numbers = #tpu.dot_dimension_numbers<[1], [0], [0], [1], [0, 0, 1, 1], [], []>} : vector<64x4xf32>, vector<4x16xf32>, vector<64x16xf32> -> vector<64x16xf32>
    %47 = vector.extract_strided_slice %46 {offsets = [0, 0], sizes = [32, 16], strides = [1, 1]} : vector<64x16xf32> to vector<32x16xf32>
    %cst_38 = arith.constant dense<0.000000e+00> : vector<32x32xf32>
    %48 = tpu.matmul %47, %1, %cst_38 {dimension_numbers = #tpu.dot_dimension_numbers<[1], [0], [0], [1], [0, 0, 1, 1], [], []>} : vector<32x16xf32>, vector<16x32xf32>, vector<32x32xf32> -> vector<32x32xf32>
    %49 = vector.extract_strided_slice %46 {offsets = [32, 0], sizes = [32, 16], strides = [1, 1]} : vector<64x16xf32> to vector<32x16xf32>
    %cst_39 = arith.constant dense<0.000000e+00> : vector<32x32xf32>
    %50 = tpu.matmul %49, %2, %cst_39 {dimension_numbers = #tpu.dot_dimension_numbers<[1], [0], [0], [1], [0, 0, 1, 1], [], []>} : vector<32x16xf32>, vector<16x32xf32>, vector<32x32xf32> -> vector<32x32xf32>
    %51 = arith.addf %48, %50 : vector<32x32xf32>
    %52 = vector.extract_strided_slice %51 {offsets = [0, 0], sizes = [2, 32], strides = [1, 1]} : vector<32x32xf32> to vector<2x32xf32>
    %53 = vector.broadcast %3 : vector<2x1xf32> to vector<2x32xf32>
    %54 = arith.addf %52, %53 : vector<2x32xf32>
    %c0_40 = arith.constant 0 : index
    %c0_41 = arith.constant 0 : index
    %c4 = arith.constant 4 : index
    %c0_42 = arith.constant 0 : index
    %55 = vector.load %arg7[%c0_40, %c0_41, %c4, %c0_42] : memref<1x2x16x32xf32, #tpu.memory_space<vmem>>, vector<1x2x1x32xf32>
    %56 = vector.shape_cast %55 : vector<1x2x1x32xf32> to vector<2x32xf32>
    %57 = vector.shape_cast %54 : vector<2x32xf32> to vector<1x2x1x32xf32>
    tpu.vector_store %arg7[%c0_40, %c0_41, %c4, %c0_42], %57 {strides = array<i32>} : memref<1x2x16x32xf32, #tpu.memory_space<vmem>>, vector<1x2x1x32xf32>,
    %58 = vector.extract_strided_slice %51 {offsets = [16, 0], sizes = [2, 32], strides = [1, 1]} : vector<32x32xf32> to vector<2x32xf32>
    %59 = vector.broadcast %3 : vector<2x1xf32> to vector<2x32xf32>
    %60 = arith.addf %58, %59 : vector<2x32xf32>
    %c0_43 = arith.constant 0 : index
    %c0_44 = arith.constant 0 : index
    %c5 = arith.constant 5 : index
    %c0_45 = arith.constant 0 : index
    %61 = vector.load %arg7[%c0_43, %c0_44, %c5, %c0_45] : memref<1x2x16x32xf32, #tpu.memory_space<vmem>>, vector<1x2x1x32xf32>
    %62 = vector.shape_cast %61 : vector<1x2x1x32xf32> to vector<2x32xf32>
    %63 = vector.shape_cast %60 : vector<2x32xf32> to vector<1x2x1x32xf32>
    tpu.vector_store %arg7[%c0_43, %c0_44, %c5, %c0_45], %63 {strides = array<i32>} : memref<1x2x16x32xf32, #tpu.memory_space<vmem>>, vector<1x2x1x32xf32>,
    %c0_46 = arith.constant 0 : index
    %c0_47 = arith.constant 0 : index
    %c3_48 = arith.constant 3 : index
    %c0_49 = arith.constant 0 : index
    %64 = vector.load %arg6[%c0_46, %c0_47, %c3_48, %c0_49] : memref<1x4x8x16xf32, #tpu.memory_space<vmem>>, vector<1x4x1x16xf32>
    %65 = vector.shape_cast %64 : vector<1x4x1x16xf32> to vector<4x16xf32>
    %cst_50 = arith.constant dense<0.000000e+00> : vector<64x16xf32>
    %66 = tpu.matmul %0, %65, %cst_50 {dimension_numbers = #tpu.dot_dimension_numbers<[1], [0], [0], [1], [0, 0, 1, 1], [], []>} : vector<64x4xf32>, vector<4x16xf32>, vector<64x16xf32> -> vector<64x16xf32>
    %67 = vector.extract_strided_slice %66 {offsets = [0, 0], sizes = [32, 16], strides = [1, 1]} : vector<64x16xf32> to vector<32x16xf32>
    %cst_51 = arith.constant dense<0.000000e+00> : vector<32x32xf32>
    %68 = tpu.matmul %67, %1, %cst_51 {dimension_numbers = #tpu.dot_dimension_numbers<[1], [0], [0], [1], [0, 0, 1, 1], [], []>} : vector<32x16xf32>, vector<16x32xf32>, vector<32x32xf32> -> vector<32x32xf32>
    %69 = vector.extract_strided_slice %66 {offsets = [32, 0], sizes = [32, 16], strides = [1, 1]} : vector<64x16xf32> to vector<32x16xf32>
    %cst_52 = arith.constant dense<0.000000e+00> : vector<32x32xf32>
    %70 = tpu.matmul %69, %2, %cst_52 {dimension_numbers = #tpu.dot_dimension_numbers<[1], [0], [0], [1], [0, 0, 1, 1], [], []>} : vector<32x16xf32>, vector<16x32xf32>, vector<32x32xf32> -> vector<32x32xf32>
    %71 = arith.addf %68, %70 : vector<32x32xf32>
    %72 = vector.extract_strided_slice %71 {offsets = [0, 0], sizes = [2, 32], strides = [1, 1]} : vector<32x32xf32> to vector<2x32xf32>
    %73 = vector.broadcast %3 : vector<2x1xf32> to vector<2x32xf32>
    %74 = arith.addf %72, %73 : vector<2x32xf32>
    %c0_53 = arith.constant 0 : index
    %c0_54 = arith.constant 0 : index
    %c6 = arith.constant 6 : index
    %c0_55 = arith.constant 0 : index
    %75 = vector.load %arg7[%c0_53, %c0_54, %c6, %c0_55] : memref<1x2x16x32xf32, #tpu.memory_space<vmem>>, vector<1x2x1x32xf32>
    %76 = vector.shape_cast %75 : vector<1x2x1x32xf32> to vector<2x32xf32>
    %77 = vector.shape_cast %74 : vector<2x32xf32> to vector<1x2x1x32xf32>
    tpu.vector_store %arg7[%c0_53, %c0_54, %c6, %c0_55], %77 {strides = array<i32>} : memref<1x2x16x32xf32, #tpu.memory_space<vmem>>, vector<1x2x1x32xf32>,
    %78 = vector.extract_strided_slice %71 {offsets = [16, 0], sizes = [2, 32], strides = [1, 1]} : vector<32x32xf32> to vector<2x32xf32>
    %79 = vector.broadcast %3 : vector<2x1xf32> to vector<2x32xf32>
    %80 = arith.addf %78, %79 : vector<2x32xf32>
    %c0_56 = arith.constant 0 : index
    %c0_57 = arith.constant 0 : index
    %c7 = arith.constant 7 : index
    %c0_58 = arith.constant 0 : index
    %81 = vector.load %arg7[%c0_56, %c0_57, %c7, %c0_58] : memref<1x2x16x32xf32, #tpu.memory_space<vmem>>, vector<1x2x1x32xf32>
    %82 = vector.shape_cast %81 : vector<1x2x1x32xf32> to vector<2x32xf32>
    %83 = vector.shape_cast %80 : vector<2x32xf32> to vector<1x2x1x32xf32>
    tpu.vector_store %arg7[%c0_56, %c0_57, %c7, %c0_58], %83 {strides = array<i32>} : memref<1x2x16x32xf32, #tpu.memory_space<vmem>>, vector<1x2x1x32xf32>,
    %c0_59 = arith.constant 0 : index
    %c0_60 = arith.constant 0 : index
    %c4_61 = arith.constant 4 : index
    %c0_62 = arith.constant 0 : index
    %84 = vector.load %arg6[%c0_59, %c0_60, %c4_61, %c0_62] : memref<1x4x8x16xf32, #tpu.memory_space<vmem>>, vector<1x4x1x16xf32>
    %85 = vector.shape_cast %84 : vector<1x4x1x16xf32> to vector<4x16xf32>
    %cst_63 = arith.constant dense<0.000000e+00> : vector<64x16xf32>
    %86 = tpu.matmul %0, %85, %cst_63 {dimension_numbers = #tpu.dot_dimension_numbers<[1], [0], [0], [1], [0, 0, 1, 1], [], []>} : vector<64x4xf32>, vector<4x16xf32>, vector<64x16xf32> -> vector<64x16xf32>
    %87 = vector.extract_strided_slice %86 {offsets = [0, 0], sizes = [32, 16], strides = [1, 1]} : vector<64x16xf32> to vector<32x16xf32>
    %cst_64 = arith.constant dense<0.000000e+00> : vector<32x32xf32>
    %88 = tpu.matmul %87, %1, %cst_64 {dimension_numbers = #tpu.dot_dimension_numbers<[1], [0], [0], [1], [0, 0, 1, 1], [], []>} : vector<32x16xf32>, vector<16x32xf32>, vector<32x32xf32> -> vector<32x32xf32>
    %89 = vector.extract_strided_slice %86 {offsets = [32, 0], sizes = [32, 16], strides = [1, 1]} : vector<64x16xf32> to vector<32x16xf32>
    %cst_65 = arith.constant dense<0.000000e+00> : vector<32x32xf32>
    %90 = tpu.matmul %89, %2, %cst_65 {dimension_numbers = #tpu.dot_dimension_numbers<[1], [0], [0], [1], [0, 0, 1, 1], [], []>} : vector<32x16xf32>, vector<16x32xf32>, vector<32x32xf32> -> vector<32x32xf32>
    %91 = arith.addf %88, %90 : vector<32x32xf32>
    %92 = vector.extract_strided_slice %91 {offsets = [0, 0], sizes = [2, 32], strides = [1, 1]} : vector<32x32xf32> to vector<2x32xf32>
    %93 = vector.broadcast %3 : vector<2x1xf32> to vector<2x32xf32>
    %94 = arith.addf %92, %93 : vector<2x32xf32>
    %c0_66 = arith.constant 0 : index
    %c0_67 = arith.constant 0 : index
    %c8 = arith.constant 8 : index
    %c0_68 = arith.constant 0 : index
    %95 = vector.load %arg7[%c0_66, %c0_67, %c8, %c0_68] : memref<1x2x16x32xf32, #tpu.memory_space<vmem>>, vector<1x2x1x32xf32>
    %96 = vector.shape_cast %95 : vector<1x2x1x32xf32> to vector<2x32xf32>
    %97 = vector.shape_cast %94 : vector<2x32xf32> to vector<1x2x1x32xf32>
    tpu.vector_store %arg7[%c0_66, %c0_67, %c8, %c0_68], %97 {strides = array<i32>} : memref<1x2x16x32xf32, #tpu.memory_space<vmem>>, vector<1x2x1x32xf32>,
    %98 = vector.extract_strided_slice %91 {offsets = [16, 0], sizes = [2, 32], strides = [1, 1]} : vector<32x32xf32> to vector<2x32xf32>
    %99 = vector.broadcast %3 : vector<2x1xf32> to vector<2x32xf32>
    %100 = arith.addf %98, %99 : vector<2x32xf32>
    %c0_69 = arith.constant 0 : index
    %c0_70 = arith.constant 0 : index
    %c9 = arith.constant 9 : index
    %c0_71 = arith.constant 0 : index
    %101 = vector.load %arg7[%c0_69, %c0_70, %c9, %c0_71] : memref<1x2x16x32xf32, #tpu.memory_space<vmem>>, vector<1x2x1x32xf32>
    %102 = vector.shape_cast %101 : vector<1x2x1x32xf32> to vector<2x32xf32>
    %103 = vector.shape_cast %100 : vector<2x32xf32> to vector<1x2x1x32xf32>
    tpu.vector_store %arg7[%c0_69, %c0_70, %c9, %c0_71], %103 {strides = array<i32>} : memref<1x2x16x32xf32, #tpu.memory_space<vmem>>, vector<1x2x1x32xf32>,
    %c0_72 = arith.constant 0 : index
    %c0_73 = arith.constant 0 : index
    %c5_74 = arith.constant 5 : index
    %c0_75 = arith.constant 0 : index
    %104 = vector.load %arg6[%c0_72, %c0_73, %c5_74, %c0_75] : memref<1x4x8x16xf32, #tpu.memory_space<vmem>>, vector<1x4x1x16xf32>
    %105 = vector.shape_cast %104 : vector<1x4x1x16xf32> to vector<4x16xf32>
    %cst_76 = arith.constant dense<0.000000e+00> : vector<64x16xf32>
    %106 = tpu.matmul %0, %105, %cst_76 {dimension_numbers = #tpu.dot_dimension_numbers<[1], [0], [0], [1], [0, 0, 1, 1], [], []>} : vector<64x4xf32>, vector<4x16xf32>, vector<64x16xf32> -> vector<64x16xf32>
    %107 = vector.extract_strided_slice %106 {offsets = [0, 0], sizes = [32, 16], strides = [1, 1]} : vector<64x16xf32> to vector<32x16xf32>
    %cst_77 = arith.constant dense<0.000000e+00> : vector<32x32xf32>
    %108 = tpu.matmul %107, %1, %cst_77 {dimension_numbers = #tpu.dot_dimension_numbers<[1], [0], [0], [1], [0, 0, 1, 1], [], []>} : vector<32x16xf32>, vector<16x32xf32>, vector<32x32xf32> -> vector<32x32xf32>
    %109 = vector.extract_strided_slice %106 {offsets = [32, 0], sizes = [32, 16], strides = [1, 1]} : vector<64x16xf32> to vector<32x16xf32>
    %cst_78 = arith.constant dense<0.000000e+00> : vector<32x32xf32>
    %110 = tpu.matmul %109, %2, %cst_78 {dimension_numbers = #tpu.dot_dimension_numbers<[1], [0], [0], [1], [0, 0, 1, 1], [], []>} : vector<32x16xf32>, vector<16x32xf32>, vector<32x32xf32> -> vector<32x32xf32>
    %111 = arith.addf %108, %110 : vector<32x32xf32>
    %112 = vector.extract_strided_slice %111 {offsets = [0, 0], sizes = [2, 32], strides = [1, 1]} : vector<32x32xf32> to vector<2x32xf32>
    %113 = vector.broadcast %3 : vector<2x1xf32> to vector<2x32xf32>
    %114 = arith.addf %112, %113 : vector<2x32xf32>
    %c0_79 = arith.constant 0 : index
    %c0_80 = arith.constant 0 : index
    %c10 = arith.constant 10 : index
    %c0_81 = arith.constant 0 : index
    %115 = vector.load %arg7[%c0_79, %c0_80, %c10, %c0_81] : memref<1x2x16x32xf32, #tpu.memory_space<vmem>>, vector<1x2x1x32xf32>
    %116 = vector.shape_cast %115 : vector<1x2x1x32xf32> to vector<2x32xf32>
    %117 = vector.shape_cast %114 : vector<2x32xf32> to vector<1x2x1x32xf32>
    tpu.vector_store %arg7[%c0_79, %c0_80, %c10, %c0_81], %117 {strides = array<i32>} : memref<1x2x16x32xf32, #tpu.memory_space<vmem>>, vector<1x2x1x32xf32>,
    %118 = vector.extract_strided_slice %111 {offsets = [16, 0], sizes = [2, 32], strides = [1, 1]} : vector<32x32xf32> to vector<2x32xf32>
    %119 = vector.broadcast %3 : vector<2x1xf32> to vector<2x32xf32>
    %120 = arith.addf %118, %119 : vector<2x32xf32>
    %c0_82 = arith.constant 0 : index
    %c0_83 = arith.constant 0 : index
    %c11 = arith.constant 11 : index
    %c0_84 = arith.constant 0 : index
    %121 = vector.load %arg7[%c0_82, %c0_83, %c11, %c0_84] : memref<1x2x16x32xf32, #tpu.memory_space<vmem>>, vector<1x2x1x32xf32>
    %122 = vector.shape_cast %121 : vector<1x2x1x32xf32> to vector<2x32xf32>
    %123 = vector.shape_cast %120 : vector<2x32xf32> to vector<1x2x1x32xf32>
    tpu.vector_store %arg7[%c0_82, %c0_83, %c11, %c0_84], %123 {strides = array<i32>} : memref<1x2x16x32xf32, #tpu.memory_space<vmem>>, vector<1x2x1x32xf32>,
    %c0_85 = arith.constant 0 : index
    %c0_86 = arith.constant 0 : index
    %c6_87 = arith.constant 6 : index
    %c0_88 = arith.constant 0 : index
    %124 = vector.load %arg6[%c0_85, %c0_86, %c6_87, %c0_88] : memref<1x4x8x16xf32, #tpu.memory_space<vmem>>, vector<1x4x1x16xf32>
    %125 = vector.shape_cast %124 : vector<1x4x1x16xf32> to vector<4x16xf32>
    %cst_89 = arith.constant dense<0.000000e+00> : vector<64x16xf32>
    %126 = tpu.matmul %0, %125, %cst_89 {dimension_numbers = #tpu.dot_dimension_numbers<[1], [0], [0], [1], [0, 0, 1, 1], [], []>} : vector<64x4xf32>, vector<4x16xf32>, vector<64x16xf32> -> vector<64x16xf32>
    %127 = vector.extract_strided_slice %126 {offsets = [0, 0], sizes = [32, 16], strides = [1, 1]} : vector<64x16xf32> to vector<32x16xf32>
    %cst_90 = arith.constant dense<0.000000e+00> : vector<32x32xf32>
    %128 = tpu.matmul %127, %1, %cst_90 {dimension_numbers = #tpu.dot_dimension_numbers<[1], [0], [0], [1], [0, 0, 1, 1], [], []>} : vector<32x16xf32>, vector<16x32xf32>, vector<32x32xf32> -> vector<32x32xf32>
    %129 = vector.extract_strided_slice %126 {offsets = [32, 0], sizes = [32, 16], strides = [1, 1]} : vector<64x16xf32> to vector<32x16xf32>
    %cst_91 = arith.constant dense<0.000000e+00> : vector<32x32xf32>
    %130 = tpu.matmul %129, %2, %cst_91 {dimension_numbers = #tpu.dot_dimension_numbers<[1], [0], [0], [1], [0, 0, 1, 1], [], []>} : vector<32x16xf32>, vector<16x32xf32>, vector<32x32xf32> -> vector<32x32xf32>
    %131 = arith.addf %128, %130 : vector<32x32xf32>
    %132 = vector.extract_strided_slice %131 {offsets = [0, 0], sizes = [2, 32], strides = [1, 1]} : vector<32x32xf32> to vector<2x32xf32>
    %133 = vector.broadcast %3 : vector<2x1xf32> to vector<2x32xf32>
    %134 = arith.addf %132, %133 : vector<2x32xf32>
    %c0_92 = arith.constant 0 : index
    %c0_93 = arith.constant 0 : index
    %c12 = arith.constant 12 : index
    %c0_94 = arith.constant 0 : index
    %135 = vector.load %arg7[%c0_92, %c0_93, %c12, %c0_94] : memref<1x2x16x32xf32, #tpu.memory_space<vmem>>, vector<1x2x1x32xf32>
    %136 = vector.shape_cast %135 : vector<1x2x1x32xf32> to vector<2x32xf32>
    %137 = vector.shape_cast %134 : vector<2x32xf32> to vector<1x2x1x32xf32>
    tpu.vector_store %arg7[%c0_92, %c0_93, %c12, %c0_94], %137 {strides = array<i32>} : memref<1x2x16x32xf32, #tpu.memory_space<vmem>>, vector<1x2x1x32xf32>,
    %138 = vector.extract_strided_slice %131 {offsets = [16, 0], sizes = [2, 32], strides = [1, 1]} : vector<32x32xf32> to vector<2x32xf32>
    %139 = vector.broadcast %3 : vector<2x1xf32> to vector<2x32xf32>
    %140 = arith.addf %138, %139 : vector<2x32xf32>
    %c0_95 = arith.constant 0 : index
    %c0_96 = arith.constant 0 : index
    %c13 = arith.constant 13 : index
    %c0_97 = arith.constant 0 : index
    %141 = vector.load %arg7[%c0_95, %c0_96, %c13, %c0_97] : memref<1x2x16x32xf32, #tpu.memory_space<vmem>>, vector<1x2x1x32xf32>
    %142 = vector.shape_cast %141 : vector<1x2x1x32xf32> to vector<2x32xf32>
    %143 = vector.shape_cast %140 : vector<2x32xf32> to vector<1x2x1x32xf32>
    tpu.vector_store %arg7[%c0_95, %c0_96, %c13, %c0_97], %143 {strides = array<i32>} : memref<1x2x16x32xf32, #tpu.memory_space<vmem>>, vector<1x2x1x32xf32>,
    %c0_98 = arith.constant 0 : index
    %c0_99 = arith.constant 0 : index
    %c7_100 = arith.constant 7 : index
    %c0_101 = arith.constant 0 : index
    %144 = vector.load %arg6[%c0_98, %c0_99, %c7_100, %c0_101] : memref<1x4x8x16xf32, #tpu.memory_space<vmem>>, vector<1x4x1x16xf32>
    %145 = vector.shape_cast %144 : vector<1x4x1x16xf32> to vector<4x16xf32>
    %cst_102 = arith.constant dense<0.000000e+00> : vector<64x16xf32>
    %146 = tpu.matmul %0, %145, %cst_102 {dimension_numbers = #tpu.dot_dimension_numbers<[1], [0], [0], [1], [0, 0, 1, 1], [], []>} : vector<64x4xf32>, vector<4x16xf32>, vector<64x16xf32> -> vector<64x16xf32>
    %147 = vector.extract_strided_slice %146 {offsets = [0, 0], sizes = [32, 16], strides = [1, 1]} : vector<64x16xf32> to vector<32x16xf32>
    %cst_103 = arith.constant dense<0.000000e+00> : vector<32x32xf32>
    %148 = tpu.matmul %147, %1, %cst_103 {dimension_numbers = #tpu.dot_dimension_numbers<[1], [0], [0], [1], [0, 0, 1, 1], [], []>} : vector<32x16xf32>, vector<16x32xf32>, vector<32x32xf32> -> vector<32x32xf32>
    %149 = vector.extract_strided_slice %146 {offsets = [32, 0], sizes = [32, 16], strides = [1, 1]} : vector<64x16xf32> to vector<32x16xf32>
    %cst_104 = arith.constant dense<0.000000e+00> : vector<32x32xf32>
    %150 = tpu.matmul %149, %2, %cst_104 {dimension_numbers = #tpu.dot_dimension_numbers<[1], [0], [0], [1], [0, 0, 1, 1], [], []>} : vector<32x16xf32>, vector<16x32xf32>, vector<32x32xf32> -> vector<32x32xf32>
    %151 = arith.addf %148, %150 : vector<32x32xf32>
    %152 = vector.extract_strided_slice %151 {offsets = [0, 0], sizes = [2, 32], strides = [1, 1]} : vector<32x32xf32> to vector<2x32xf32>
    %153 = vector.broadcast %3 : vector<2x1xf32> to vector<2x32xf32>
    %154 = arith.addf %152, %153 : vector<2x32xf32>
    %c0_105 = arith.constant 0 : index
    %c0_106 = arith.constant 0 : index
    %c14 = arith.constant 14 : index
    %c0_107 = arith.constant 0 : index
    %155 = vector.load %arg7[%c0_105, %c0_106, %c14, %c0_107] : memref<1x2x16x32xf32, #tpu.memory_space<vmem>>, vector<1x2x1x32xf32>
    %156 = vector.shape_cast %155 : vector<1x2x1x32xf32> to vector<2x32xf32>
    %157 = vector.shape_cast %154 : vector<2x32xf32> to vector<1x2x1x32xf32>
    tpu.vector_store %arg7[%c0_105, %c0_106, %c14, %c0_107], %157 {strides = array<i32>} : memref<1x2x16x32xf32, #tpu.memory_space<vmem>>, vector<1x2x1x32xf32>,
    %158 = vector.extract_strided_slice %151 {offsets = [16, 0], sizes = [2, 32], strides = [1, 1]} : vector<32x32xf32> to vector<2x32xf32>
    %159 = vector.broadcast %3 : vector<2x1xf32> to vector<2x32xf32>
    %160 = arith.addf %158, %159 : vector<2x32xf32>
    %c0_108 = arith.constant 0 : index
    %c0_109 = arith.constant 0 : index
    %c15 = arith.constant 15 : index
    %c0_110 = arith.constant 0 : index
    %161 = vector.load %arg7[%c0_108, %c0_109, %c15, %c0_110] : memref<1x2x16x32xf32, #tpu.memory_space<vmem>>, vector<1x2x1x32xf32>
    %162 = vector.shape_cast %161 : vector<1x2x1x32xf32> to vector<2x32xf32>
    %163 = vector.shape_cast %160 : vector<2x32xf32> to vector<1x2x1x32xf32>
    tpu.vector_store %arg7[%c0_108, %c0_109, %c15, %c0_110], %163 {strides = array<i32>} : memref<1x2x16x32xf32, #tpu.memory_space<vmem>>, vector<1x2x1x32xf32>,
    return
  }
  func.func @transform_0(%arg0: i32, %arg1: i32) -> (i32, i32) {
    %c0_i32 = arith.constant 0 : i32
    %c0_i32_0 = arith.constant 0 : i32
    %c0_i32_1 = arith.constant 0 : i32
    return %c0_i32, %c0_i32_0 : i32, i32
  }
  func.func @transform_1(%arg0: i32, %arg1: i32) -> (i32, i32) {
    %c0_i32 = arith.constant 0 : i32
    %c0_i32_0 = arith.constant 0 : i32
    %c0_i32_1 = arith.constant 0 : i32
    return %c0_i32, %c0_i32_0 : i32, i32
  }
  func.func @transform_2(%arg0: i32, %arg1: i32) -> (i32, i32) {
    %c0_i32 = arith.constant 0 : i32
    %c0_i32_0 = arith.constant 0 : i32
    %c0_i32_1 = arith.constant 0 : i32
    return %c0_i32, %c0_i32_0 : i32, i32
  }
  func.func @transform_3(%arg0: i32, %arg1: i32) -> (i32, i32) {
    %c0_i32 = arith.constant 0 : i32
    %c0_i32_0 = arith.constant 0 : i32
    %c0_i32_1 = arith.constant 0 : i32
    return %c0_i32, %c0_i32_0 : i32, i32
  }
  func.func @transform_4(%arg0: i32, %arg1: i32) -> (i32, i32, i32, i32) {
    %c0_i32 = arith.constant 0 : i32
    %c0_i32_0 = arith.constant 0 : i32
    %c0_i32_1 = arith.constant 0 : i32
    return %arg0, %c0_i32, %arg1, %c0_i32_0 : i32, i32, i32, i32
  }
  func.func @transform_5(%arg0: i32, %arg1: i32) -> (i32, i32, i32, i32) {
    %c0_i32 = arith.constant 0 : i32
    %c0_i32_0 = arith.constant 0 : i32
    %c0_i32_1 = arith.constant 0 : i32
    return %arg0, %c0_i32, %arg1, %c0_i32_0 : i32, i32, i32, i32
  }
}

module attributes {stable_mosaic.version = 11 : i64} {
  func.func @_upsample_matmul_kernel(%arg0: i32, %arg1: i32, %arg2: memref<16x4xf32, #tpu.memory_space<vmem>>, %arg3: memref<16x1xf32, #tpu.memory_space<vmem>>, %arg4: memref<1x4x256xf32, #tpu.memory_space<vmem>>, %arg5: memref<1x16x256xf32, #tpu.memory_space<vmem>>) attributes {dimension_semantics = [#tpu.dimension_semantics<parallel>, #tpu.dimension_semantics<parallel>], iteration_bounds = array<i64: 2, 1>, scalar_prefetch = 0 : i64, scratch_operands = 0 : i64, tpu.core_type = #tpu.core_type<tc>, window_params = [{pipeline_mode = #tpu.pipeline_mode<synchronous>, transform_indices = @transform_0, window_bounds = array<i64: 16, 4>}, {pipeline_mode = #tpu.pipeline_mode<synchronous>, transform_indices = @transform_1, window_bounds = array<i64: 16, 1>}, {transform_indices = @transform_2, window_bounds = array<i64: 1, 4, 256>}, {transform_indices = @transform_3, window_bounds = array<i64: 1, 16, 256>}]} {
    %c0 = arith.constant 0 : index
    %c0_0 = arith.constant 0 : index
    %0 = vector.load %arg2[%c0, %c0_0] : memref<16x4xf32, #tpu.memory_space<vmem>>, vector<16x4xf32>
    %c0_1 = arith.constant 0 : index
    %c0_2 = arith.constant 0 : index
    %c0_3 = arith.constant 0 : index
    %1 = vector.load %arg4[%c0_1, %c0_2, %c0_3] : memref<1x4x256xf32, #tpu.memory_space<vmem>>, vector<1x4x256xf32>
    %2 = vector.shape_cast %1 : vector<1x4x256xf32> to vector<4x256xf32>
    %cst = arith.constant dense<0.000000e+00> : vector<16x256xf32>
    %3 = tpu.matmul %0, %2, %cst {dimension_numbers = #tpu.dot_dimension_numbers<[1], [0], [0], [1], [0, 0, 1, 1], [], []>} : vector<16x4xf32>, vector<4x256xf32>, vector<16x256xf32> -> vector<16x256xf32>
    %c0_4 = arith.constant 0 : index
    %c0_5 = arith.constant 0 : index
    %4 = vector.load %arg3[%c0_4, %c0_5] : memref<16x1xf32, #tpu.memory_space<vmem>>, vector<16x1xf32>
    %5 = vector.broadcast %4 : vector<16x1xf32> to vector<16x256xf32>
    %6 = arith.addf %3, %5 : vector<16x256xf32>
    %c0_6 = arith.constant 0 : index
    %c0_7 = arith.constant 0 : index
    %c0_8 = arith.constant 0 : index
    %7 = vector.load %arg5[%c0_6, %c0_7, %c0_8] : memref<1x16x256xf32, #tpu.memory_space<vmem>>, vector<1x16x256xf32>
    %8 = vector.shape_cast %7 : vector<1x16x256xf32> to vector<16x256xf32>
    %9 = vector.shape_cast %6 : vector<16x256xf32> to vector<1x16x256xf32>
    tpu.vector_store %arg5[%c0_6, %c0_7, %c0_8], %9 {strides = array<i32>} : memref<1x16x256xf32, #tpu.memory_space<vmem>>, vector<1x16x256xf32>,
    return
  }
  func.func @transform_0(%arg0: i32, %arg1: i32) -> (i32, i32) {
    %c0_i32 = arith.constant 0 : i32
    %c0_i32_0 = arith.constant 0 : i32
    %c0_i32_1 = arith.constant 0 : i32
    return %c0_i32, %c0_i32_0 : i32, i32
  }
  func.func @transform_1(%arg0: i32, %arg1: i32) -> (i32, i32) {
    %c0_i32 = arith.constant 0 : i32
    %c0_i32_0 = arith.constant 0 : i32
    %c0_i32_1 = arith.constant 0 : i32
    return %c0_i32, %c0_i32_0 : i32, i32
  }
  func.func @transform_2(%arg0: i32, %arg1: i32) -> (i32, i32, i32) {
    %c0_i32 = arith.constant 0 : i32
    %c0_i32_0 = arith.constant 0 : i32
    return %arg0, %c0_i32, %arg1 : i32, i32, i32
  }
  func.func @transform_3(%arg0: i32, %arg1: i32) -> (i32, i32, i32) {
    %c0_i32 = arith.constant 0 : i32
    %c0_i32_0 = arith.constant 0 : i32
    return %arg0, %c0_i32, %arg1 : i32, i32, i32
  }
}

</mosaic_0001>

<bundles_post_ra>
// kernel: _upsample_fused.1
= control target key start
LH: loop header
LB: loop body
LE: loop exit
PB: predicated region body
PF: predicated region fallthrough
CT: control target
= control target key end

     0   :  { %s4893_s0 = inlined_call_operand.vmem [shape: f32[64,4], index: 0, kind: input, shape index: {}]   ;;  %s4894_s1 = inlined_call_operand.vmem [shape: f32[2,1], index: 1, kind: input, shape index: {}]   ;;  %s4895_s2 = inlined_call_operand.vmem [shape: f32[16,32], index: 2, kind: input, shape index: {}]   ;;  %s4896_s3 = inlined_call_operand.vmem [shape: f32[16,32], index: 3, kind: input, shape index: {}]   ;;  %s4897_s4 = inlined_call_operand.vmem [shape: f32[2,4,16,16], index: 4, kind: input, shape index: {}]   ;;  %s4898_s5 = inlined_call_operand.hbm [shape: f32[2,2,32,32], index: 5, kind: output, shape index: {}]  }
   0x1   :  { %4899 = sst [smem:[#allocation8_spill]] %s4893_s0 }
   0x2   :  { %10 = vsyncpa [#allocation4], 0 }
   0x3   :  { %12 = vsyncpa [#allocation4 + $0x1], 0  ;;  %s4252_s18 = smov 0   ;;  %s4254_s19 = smov 0  }
   0x4   :  { %s4256_s20 = smov 0   ;;  %s4258_s21 = smov 0  }
   0x5   :  { %s4260_s22 = smov 0   ;;  %s4262_s23 = smov 0  }
   0x6   :  { %s4264_s24 = smov 0   ;;  %s4266_s25 = smov 0  }
   0x7 LB: > { %s3402_s26 = sadd.s32 4294967295, %s4211_s25   ;;  %s3403_s27 = sadd.s32 4294967294, %s4211_s25   ;;  %s4211_s25 = sphi %s4266_s25, %s18_s25   ;;  %s4207_s24 = sphi %s4264_s24, %s4910_s24   ;;  %s4203_s23 = sphi %s4262_s23, %s4909_s23   ;;  %s4199_s22 = sphi %s4260_s22, %s4908_s22   ;;  %s4195_s21 = sphi %s4258_s21, %s4907_s21   ;;  %s4191_s20 = sphi %s4256_s20, %s4906_s20   ;;  %s4187_s19 = sphi %s4254_s19, %s4905_s19   ;;  %s4183_s18 = sphi %s4252_s18, %s4904_s18  }
   0x8   : > { %s27_s28 = sadd.s32 1, %s4203_s23  ;;  %s30_s29 = sadd.s32 1, %s4207_s24 }
   0x9   : > { %p28_p0 = scmp.ge.s32.totalorder %s27_s28, 2  ;;  %p130_p1 = scmp.ne.s32.totalorder %s4191_s20, %s4187_s19 }
   0xa   : > { %p131_p2 = scmp.eq.s32.totalorder %s4211_s25, 0  ;;  %p162_p5 = scmp.eq.s32.totalorder %s3402_s26, 3 }
   0xb   : > { %s4912_s28 = smov (%p28_p0, %s27_s28), 0  ;;  %s4914_s29 = smov (!%p28_p0, %s30_s29), %s4207_s24 }
   0xc   : > { %s119_s30 = ssub.s32 %s4203_s23, %s4912_s28  ;;  %p4304_p3 = por %p131_p2, %p130_p1 }
   0xd   : > { %p32_p4 = scmp.ge.s32.totalorder %s4914_s29, 2  ;;  %p167_p6 = scmp.ne.s32.totalorder %s4187_s19, %s4183_s18 }
   0xe   : > { %p168_p7 = scmp.eq.s32.totalorder %s3403_s27, 3  ;;  %p4312_p8 = por %p162_p5, %p130_p1 }
   0xf   : > { %s4916_s29 = smov (%p32_p4, %s4914_s29), 0  ;;  %s123_s11 = sadd.s32 1, %s4191_s20 }
  0x10   : > { %p4316_p9 = por %p168_p7, %p167_p6  ;;  %s118_s9 = ssub.s32 %s4207_s24, %s4916_s29 }
  0x11   : > { %s120_s10 = sor.u32 %s119_s30, %s118_s9  ;;  %p3405_p11 = scmp.ge.s32.totalorder %s4211_s25, 4 }
  0x12   : > { %p121_p10 = scmp.eq.s32.totalorder %s120_s10, 0 }
  0x13   : > { %196 = sbr.rel (%p3405_p11) target bundleno = 34 (0x22), region = 32 }
  0x14   : > { %s4324_s12 = scalar_select %p121_p10, %s4191_s20, %s123_s11  }
  0x1a   : > { %199 = sbr.rel (!%p4304_p3) target bundleno = 34 (0x22), region = 36  ;;  %s201_s13 = sand.u32 (%p4304_p3), 1, %s4191_s20  }
  0x1b   : > { %s3407_s14 = sshll.u32 (%p4304_p3), %s4207_s24, 3  ;;  %s3406_s15 = sshll.u32 (%p4304_p3), %s201_s13, 5 }
  0x1c   : > { %s205_s16 = sadd.s32 (%p4304_p3), %s4203_s23, %s3407_s14  ;;  %s203_s9 = scalar_lea.vmem (%p4304_p3), [#allocation2], %s3406_s15 }
  0x1d   : > { %s3408_s17 = sshll.u32 (%p4304_p3), %s205_s16, 3 }
  0x1e   : > { %s207_s30 = scalar_lea.vmem (%p4304_p3), %s4897_s4, %s3408_s17 }
  0x1f   : > { %v241_v0 = vld [vmem:[%s207_s30] sm:$0xff] (%p4304_p3)  ;;  %v243_v1 = vld [vmem:[%s207_s30 + $0x10] sm:$0xff] (%p4304_p3) }
  0x20   : > { %v245_v2 = vld [vmem:[%s207_s30 + $0x20] sm:$0xff] (%p4304_p3)  ;;  %242 = vst [vmem:[%s203_s9] sm:$0xff] (%p4304_p3), %v241_v0  ;;  %244 = vst [vmem:[%s203_s9 + $0x8] sm:$0xff] (%p4304_p3), %v243_v1  ;;  %v247_v3 = vld [vmem:[%s207_s30 + $0x30] sm:$0xff] (%p4304_p3) }
  0x21   : > { %246 = vst [vmem:[%s203_s9 + $0x10] sm:$0xff] %v245_v2  ;;  %248 = vst [vmem:[%s203_s9 + $0x18] sm:$0xff] %v247_v3 }
  0x22 PF: > { %p3409_p12 = scmp.ge.s32.totalorder %s4211_s25, 1  ;;  %p253_p13 = scmp.lt.s32.totalorder %s4211_s25, 5 }
  0x24   : > { %p254_p0 = pnand %p3409_p12, %p253_p13 }
  0x25   : > { %s260_s6 = sand.u32 (!%p254_p0), 1, %s4187_s19   ;;  %s4903_s0 = sld [smem:[#allocation8_spill]] (!%p254_p0)  ;;  %vm318_vm0 = vcmask (!%p254_p0), 31744   ;;  %vm310_vm1 = vcmask (!%p254_p0), 1041409   ;;  %vm313_vm2 = vcmask (!%p254_p0), 1042434   ;;  %vm316_vm3 = vcmask (!%p254_p0), 1043459  }
  0x26   : > { %257 = sbr.rel (%p254_p0) target bundleno = 629 (0x275), region = 74  ;;  %s4345_s13 = sshll.u32 (!%p254_p0), %s260_s6, 5  ;;  %vm343_vm4 = vcmask (!%p254_p0), 1043456   ;;  %vm451_vm5 = vcmask (!%p254_p0), 130048   ;;  %vm673_vm6 = vcmask (!%p254_p0), 253952  }
  0x27   : > { %s4350_s14 = scalar_lea.vmem (!%p254_p0), [#allocation2], %s4345_s13 }
  0x28   : > { %v301_v5 = vld [vmem:[%s4350_s14] sm:$0x1] (!%p254_p0)  ;;  %v302_v6 = vld [vmem:[%s4350_s14 + $0x8] sm:$0x1] (!%p254_p0)  ;;  %v303_v7 = vld [vmem:[%s4350_s14 + $0x10] sm:$0x1] (!%p254_p0) }
  0x29   : > { %v304_v8 = vld [vmem:[%s4350_s14 + $0x18] sm:$0x1] (!%p254_p0)  ;;  %v309_v9 = vrot.slane (!%p254_p0), %v302_v6, 7  ;;  %v312_v10 = vrot.slane (!%p254_p0), %v303_v7, 6  ;;  %v704_v11 = vld [vmem:[%s4350_s14 + $0x1] sm:$0x1] (!%p254_p0) }
  0x2a   : > { %v315_v12 = vrot.slane (!%p254_p0), %v304_v8, 5  ;;  %v705_v13 = vld [vmem:[%s4350_s14 + $0x9] sm:$0x1] (!%p254_p0)  ;;  %v706_v14 = vld [vmem:[%s4350_s14 + $0x11] sm:$0x1] (!%p254_p0) }
  0x2b   : > { %v4341_v4 = vld [vmem:[%s4903_s0] sm:$0xff] (!%p254_p0)  ;;  %v311_v15 = vsel (!%p254_p0), %vm310_vm1, %v309_v9, %v301_v5  ;;  %v707_v16 = vld [vmem:[%s4350_s14 + $0x19] sm:$0x1] (!%p254_p0)  ;;  %v712_v17 = vrot.slane (!%p254_p0), %v705_v13, 7  ;;  %v714_v18 = vrot.slane (!%p254_p0), %v706_v14, 6  ;;  %v4369_v25 = vld [vmem:[%s4903_s0 + $0x8] sm:$0xff] (!%p254_p0) }
  0x2c   : > { %3724 = vmatprep.mubr.msk.f32.mxu0 (!%p254_p0), %vm318_vm0, %v4341_v4  ;;  %v1071_v19 = vld [vmem:[%s4350_s14 + $0x2] sm:$0x1] (!%p254_p0)  ;;  %v314_v20 = vsel (!%p254_p0), %vm313_vm2, %v312_v10, %v311_v15  ;;  %v716_v21 = vrot.slane (!%p254_p0), %v707_v16, 5  ;;  %v1072_v22 = vld [vmem:[%s4350_s14 + $0xa] sm:$0x1] (!%p254_p0)  ;;  %v4378_v31 = vld [vmem:[%s4903_s0 + $0x10] sm:$0xff] (!%p254_p0) }
  0x2d   : > { %v1073_v23 = vld [vmem:[%s4350_s14 + $0x12] sm:$0x1]  ;;  %v317_v24 = vsel %vm316_vm3, %v315_v12, %v314_v20  ;;  %v713_v26 = vsel %vm310_vm1, %v712_v17, %v704_v11  ;;  %v1074_v27 = vld [vmem:[%s4350_s14 + $0x1a] sm:$0x1]  ;;  %v1079_v28 = vrot.slane %v1072_v22, 7  ;;  %v4400_v39 = vld [vmem:[%s4903_s0 + $0x20] sm:$0xff] }
  0x2e   : > { %v1081_v29 = vrot.slane %v1073_v23, 6  ;;  %3722 = vmatprep.subr.msk.mxu0 %vm343_vm4, %v317_v24  ;;  %v715_v30 = vsel %vm313_vm2, %v714_v18, %v713_v26  ;;  %v1083_v32 = vrot.slane %v1074_v27, 5  ;;  %v1439_v36 = vld [vmem:[%s4350_s14 + $0xb] sm:$0x1]  ;;  %v4394_v37 = vld [vmem:[%s4903_s0 + $0x18] sm:$0xff]  ;;  %v4422_v51 = vld [vmem:[%s4903_s0 + $0x30] sm:$0xff] }
  0x2f   : > { %3723 = vmatpush3.msk.msra.mxu0 %vm343_vm4, %v317_v24  ;;  %v717_v33 = vsel %vm316_vm3, %v716_v21, %v715_v30  ;;  %v1080_v34 = vsel %vm310_vm1, %v1079_v28, %v1071_v19  ;;  %v4406_v40 = vld [vmem:[%s4903_s0 + $0x28] sm:$0xff]  ;;  %v1440_v41 = vld [vmem:[%s4350_s14 + $0x13] sm:$0x1]  ;;  %v1446_v42 = vrot.slane %v1439_v36, 7  ;;  %v1438_v43 = vld [vmem:[%s4350_s14 + $0x3] sm:$0x1] }
  0x30   : > { %3725 = vmatmul.mubr.msk.f32.vlgmr.msra.gmra.mrb[0].mxu0 %vm318_vm0, %v4369_v25  ;;  %3756 = vmatprep.subr.msk.mxu0 %vm343_vm4, %v717_v33  ;;  %v1082_v35 = vsel %vm313_vm2, %v1081_v29, %v1080_v34  ;;  %v2539_v44 = vld [vmem:[%s4350_s14 + $0x6] sm:$0x1]  ;;  %v2540_v45 = vld [vmem:[%s4350_s14 + $0xe] sm:$0x1]  ;;  %v2541_v46 = vld [vmem:[%s4350_s14 + $0x16] sm:$0x1] }
  0x31   : > { %3757 = vmatpush3.msk.msra.mxu0 %vm343_vm4, %v717_v33  ;;  %3727 = vmatprep.mubr.msk.f32.mxu0 %vm318_vm0, %v4378_v31  ;;  %v1084_v38 = vsel %vm316_vm3, %v1083_v32, %v1082_v35  ;;  %v2542_v47 = vld [vmem:[%s4350_s14 + $0x1e] sm:$0x1]  ;;  %v2547_v48 = vrot.slane %v2540_v45, 7  ;;  %v2549_v49 = vrot.slane %v2541_v46, 6  ;;  %v2906_v50 = vld [vmem:[%s4350_s14 + $0x7] sm:$0x1]  ;;  %v1447_v0 = vsel %vm310_vm1, %v1446_v42, %v1438_v43 }
  0x32   : > { %3790 = vmatprep.subr.msk.mxu0 %vm343_vm4, %v1084_v38  ;;  %v2551_v52 = vrot.slane %v2542_v47, 5  ;;  %v2907_v53 = vld [vmem:[%s4350_s14 + $0xf] sm:$0x1]  ;;  %v2908_v54 = vld [vmem:[%s4350_s14 + $0x17] sm:$0x1]  ;;  %v1448_v60 = vrot.slane %v1440_v41, 6 }
  0x33   : > { %v2548_v55 = vsel %vm310_vm1, %v2547_v48, %v2539_v44  ;;  %v2909_v56 = vld [vmem:[%s4350_s14 + $0x1f] sm:$0x1]  ;;  %v2914_v57 = vrot.slane %v2907_v53, 7  ;;  %v2916_v58 = vrot.slane %v2908_v54, 6  ;;  %v1441_v59 = vld [vmem:[%s4350_s14 + $0x1b] sm:$0x1] }
  0x34   : > { %3728 = vmatmul.mubr.msk.f32.gmra.mrb[2].mxu0 %vm318_vm0, %v4394_v37  ;;  %v2550_v61 = vsel %vm313_vm2, %v2549_v49, %v2548_v55  ;;  %v2918_v62 = vrot.slane %v2909_v56, 5  ;;  %v4437_v63 = vld [vmem:[%s4903_s0 + $0x38] sm:$0xff]  ;;  %v1450_v5 = vrot.slane %v1441_v59, 5  ;;  %v1449_v7 = vsel %vm313_vm2, %v1448_v60, %v1447_v0  ;;  %v1806_v9 = vld [vmem:[%s4350_s14 + $0xc] sm:$0x1]  ;;  %v298_v30 = vld [vmem:[%s4896_s3] sm:$0xff] }
  0x35   : > { %3730 = vmatprep.mubr.msk.f32.mxu0 %vm318_vm0, %v4400_v39  ;;  %v4441_v1 = vsel %vm316_vm3, %v2551_v52, %v2550_v61  ;;  %v2915_v2 = vsel %vm310_vm1, %v2914_v57, %v2906_v50  ;;  %v1807_v10 = vld [vmem:[%s4350_s14 + $0x14] sm:$0x1]  ;;  %v1813_v11 = vrot.slane %v1806_v9, 7  ;;  %v1805_v12 = vld [vmem:[%s4350_s14 + $0x4] sm:$0x1]  ;;  %v299_v32 = vld [vmem:[%s4896_s3 + $0x8] sm:$0xff] }
  0x36   : > { %v2917_v3 = vsel %vm313_vm2, %v2916_v58, %v2915_v2  ;;  %v1451_v8 = vsel %vm316_vm3, %v1450_v5, %v1449_v7  ;;  %v1808_v13 = vld [vmem:[%s4350_s14 + $0x1c] sm:$0x1]  ;;  %v1815_v14 = vrot.slane %v1807_v10, 6  ;;  %v2173_v19 = vld [vmem:[%s4350_s14 + $0xd] sm:$0x1]  ;;  %v4561_v33 = vpack.c.bf16 %v299_v32, %v298_v30  ;;  %v296_v34 = vld [vmem:[%s4895_s2] sm:$0xff] }
  0x37   : > { %v4446_v6 = vsel %vm316_vm3, %v2918_v62, %v2917_v3  ;;  %v1814_v15 = vsel %vm310_vm1, %v1813_v11, %v1805_v12  ;;  %v1817_v16 = vrot.slane %v1808_v13, 5  ;;  %v2174_v20 = vld [vmem:[%s4350_s14 + $0x15] sm:$0x1]  ;;  %v2180_v21 = vrot.slane %v2173_v19, 7  ;;  %v2172_v22 = vld [vmem:[%s4350_s14 + $0x5] sm:$0x1] }
  0x38   : > { %3731 = vmatmul.mubr.msk.f32.gmra.mrb[4].mxu0 %vm318_vm0, %v4406_v40  ;;  %v1816_v17 = vsel %vm313_vm2, %v1815_v14, %v1814_v15  ;;  %v2175_v23 = vld [vmem:[%s4350_s14 + $0x1d] sm:$0x1]  ;;  %v2182_v24 = vrot.slane %v2174_v20, 6  ;;  %3995 = vmatprep.subr.bf16.mxu1 %v4561_v33  ;;  %v297_v35 = vld [vmem:[%s4895_s2 + $0x8] sm:$0xff]  ;;  %s4718_s14 = scalar_lea.vmem [#allocation3], %s4345_s13  ;;  %s3274_s13 = scalar_lea.sflag [#allocation4], %s260_s6 }
  0x39   : > { %3733 = vmatprep.mubr.msk.f32.mxu0 %vm318_vm0, %v4422_v51  ;;  %v1818_v18 = vsel %vm316_vm3, %v1817_v16, %v1816_v17  ;;  %v2181_v26 = vsel %vm310_vm1, %v2180_v21, %v2172_v22  ;;  %v2184_v27 = vrot.slane %v2175_v23, 5  ;;  %3997 = vmatpush3.bf16.msra.mxu1 %v4561_v33  ;;  %v4577_v36 = vpack.c.bf16 %v297_v35, %v296_v34 }
  0x3a   : > { %v2183_v28 = vsel %vm313_vm2, %v2182_v24, %v2181_v26 }
  0x3b   : > { %v2185_v29 = vsel %vm316_vm3, %v2184_v27, %v2183_v28  ;;  %3999 = vmatprep.subr.bf16.mxu1 %v4577_v36 }
  0x3c   : > { %3734 = vmatmul.mubr.msk.f32.gmra.mrb[6].mxu0 %vm318_vm0, %v4437_v63 }
  0x3d   : > { %3758 = vmatprep.mubr.msk.f32.mxu0 %vm318_vm0, %v4341_v4 }
  0x40   : > { %3759 = vmatmul.mubr.msk.f32.vlgmr.msra.gmra.mrb[8].mxu0 %vm318_vm0, %v4369_v25 }
  0x41   : > { %3791 = vmatpush3.msk.msra.mxu0 %vm343_vm4, %v1084_v38  ;;  %3761 = vmatprep.mubr.msk.f32.mxu0 %vm318_vm0, %v4378_v31 }
  0x42   : > { %3824 = vmatprep.subr.msk.mxu0 %vm343_vm4, %v1451_v8 }
  0x44   : > { %3762 = vmatmul.mubr.msk.f32.gmra.mrb[10].mxu0 %vm318_vm0, %v4394_v37 }
  0x45   : > { %3764 = vmatprep.mubr.msk.f32.mxu0 %vm318_vm0, %v4400_v39 }
  0x48   : > { %3765 = vmatmul.mubr.msk.f32.gmra.mrb[12].mxu0 %vm318_vm0, %v4406_v40 }
  0x49   : > { %3767 = vmatprep.mubr.msk.f32.mxu0 %vm318_vm0, %v4422_v51 }
  0x4c   : > { %3768 = vmatmul.mubr.msk.f32.gmra.mrb[14].mxu0 %vm318_vm0, %v4437_v63 }
  0x4d   : > { %3792 = vmatprep.mubr.msk.f32.mxu0 %vm318_vm0, %v4341_v4 }
  0x50   : > { %3793 = vmatmul.mubr.msk.f32.vlgmr.msra.gmra.mrb[16].mxu0 %vm318_vm0, %v4369_v25 }
  0x51   : > { %3825 = vmatpush3.msk.msra.mxu0 %vm343_vm4, %v1451_v8  ;;  %3795 = vmatprep.mubr.msk.f32.mxu0 %vm318_vm0, %v4378_v31 }
  0x52   : > { %3858 = vmatprep.subr.msk.mxu0 %vm343_vm4, %v1818_v18 }
  0x54   : > { %3796 = vmatmul.mubr.msk.f32.gmra.mrb[18].mxu0 %vm318_vm0, %v4394_v37 }
  0x55   : > { %3798 = vmatprep.mubr.msk.f32.mxu0 %vm318_vm0, %v4400_v39 }
  0x58   : > { %3799 = vmatmul.mubr.msk.f32.gmra.mrb[20].mxu0 %vm318_vm0, %v4406_v40 }
  0x59   : > { %3801 = vmatprep.mubr.msk.f32.mxu0 %vm318_vm0, %v4422_v51 }
  0x5c   : > { %3802 = vmatmul.mubr.msk.f32.gmra.mrb[22].mxu0 %vm318_vm0, %v4437_v63 }
  0x5d   : > { %3826 = vmatprep.mubr.msk.f32.mxu0 %vm318_vm0, %v4341_v4 }
  0x60   : > { %3827 = vmatmul.mubr.msk.f32.vlgmr.msra.gmra.mrb[24].mxu0 %vm318_vm0, %v4369_v25 }
  0x61   : > { %3859 = vmatpush3.msk.msra.mxu0 %vm343_vm4, %v1818_v18  ;;  %3829 = vmatprep.mubr.msk.f32.mxu0 %vm318_vm0, %v4378_v31 }
  0x62   : > { %3892 = vmatprep.subr.msk.mxu0 %vm343_vm4, %v2185_v29 }
  0x64   : > { %3830 = vmatmul.mubr.msk.f32.gmra.mrb[26].mxu0 %vm318_vm0, %v4394_v37 }
  0x65   : > { %3832 = vmatprep.mubr.msk.f32.mxu0 %vm318_vm0, %v4400_v39 }
  0x68   : > { %3833 = vmatmul.mubr.msk.f32.gmra.mrb[28].mxu0 %vm318_vm0, %v4406_v40 }
  0x69   : > { %3835 = vmatprep.mubr.msk.f32.mxu0 %vm318_vm0, %v4422_v51 }
  0x6c   : > { %3836 = vmatmul.mubr.msk.f32.gmra.mrb[30].mxu0 %vm318_vm0, %v4437_v63 }
  0x6d   : > { %3860 = vmatprep.mubr.msk.f32.mxu0 %vm318_vm0, %v4341_v4 }
  0x70   : > { %3861 = vmatmul.mubr.msk.f32.vlgmr.msra.gmra.mrb[32].mxu0 %vm318_vm0, %v4369_v25 }
  0x71   : > { %3893 = vmatpush3.msk.msra.mxu0 %vm343_vm4, %v2185_v29  ;;  %3863 = vmatprep.mubr.msk.f32.mxu0 %vm318_vm0, %v4378_v31 }
  0x72   : > { %3926 = vmatprep.subr.msk.mxu0 %vm343_vm4, %v4441_v1 }
  0x74   : > { %3864 = vmatmul.mubr.msk.f32.gmra.mrb[34].mxu0 %vm318_vm0, %v4394_v37 }
  0x75   : > { %3866 = vmatprep.mubr.msk.f32.mxu0 %vm318_vm0, %v4400_v39 }
  0x78   : > { %3867 = vmatmul.mubr.msk.f32.gmra.mrb[36].mxu0 %vm318_vm0, %v4406_v40 }
  0x79   : > { %3869 = vmatprep.mubr.msk.f32.mxu0 %vm318_vm0, %v4422_v51 }
  0x7c   : > { %3870 = vmatmul.mubr.msk.f32.gmra.mrb[38].mxu0 %vm318_vm0, %v4437_v63 }
  0x7d   : > { %3894 = vmatprep.mubr.msk.f32.mxu0 %vm318_vm0, %v4341_v4 }
  0x80   : > { %3895 = vmatmul.mubr.msk.f32.vlgmr.msra.gmra.mrb[40].mxu0 %vm318_vm0, %v4369_v25 }
  0x81   : > { %3927 = vmatpush3.msk.msra.mxu0 %vm343_vm4, %v4441_v1  ;;  %3897 = vmatprep.mubr.msk.f32.mxu0 %vm318_vm0, %v4378_v31 }
  0x82   : > { %3960 = vmatprep.subr.msk.mxu0 %vm343_vm4, %v4446_v6 }
  0x84   : > { %3898 = vmatmul.mubr.msk.f32.gmra.mrb[42].mxu0 %vm318_vm0, %v4394_v37 }
  0x85   : > { %3900 = vmatprep.mubr.msk.f32.mxu0 %vm318_vm0, %v4400_v39 }
  0x88   : > { %3901 = vmatmul.mubr.msk.f32.gmra.mrb[44].mxu0 %vm318_vm0, %v4406_v40 }
  0x89   : > { %3903 = vmatprep.mubr.msk.f32.mxu0 %vm318_vm0, %v4422_v51 }
  0x8c   : > { %3904 = vmatmul.mubr.msk.f32.gmra.mrb[46].mxu0 %vm318_vm0, %v4437_v63 }
  0x8d   : > { %3928 = vmatprep.mubr.msk.f32.mxu0 %vm318_vm0, %v4341_v4 }
  0x90   : > { %3929 = vmatmul.mubr.msk.f32.vlgmr.msra.gmra.mrb[48].mxu0 %vm318_vm0, %v4369_v25 }
  0x91   : > { %3961 = vmatpush3.msk.msra.mxu0 %vm343_vm4, %v4446_v6  ;;  %3931 = vmatprep.mubr.msk.f32.mxu0 %vm318_vm0, %v4378_v31 }
  0x94   : > { %3932 = vmatmul.mubr.msk.f32.gmra.mrb[50].mxu0 %vm318_vm0, %v4394_v37 }
  0x95   : > { %3934 = vmatprep.mubr.msk.f32.mxu0 %vm318_vm0, %v4400_v39 }
  0x98   : > { %3935 = vmatmul.mubr.msk.f32.gmra.mrb[52].mxu0 %vm318_vm0, %v4406_v40 }
  0x99   : > { %3937 = vmatprep.mubr.msk.f32.mxu0 %vm318_vm0, %v4422_v51 }
  0x9c   : > { %3938 = vmatmul.mubr.msk.f32.gmra.mrb[54].mxu0 %vm318_vm0, %v4437_v63 }
  0x9d   : > { %3962 = vmatprep.mubr.msk.f32.mxu0 %vm318_vm0, %v4341_v4  ;;  %v4213_v4 = vmov 0  }
  0x9e   : > { %4144 = vset.pattern.permute.xlu0 %v4213_v4 }
  0xa0   : > { %3963 = vmatmul.mubr.msk.f32.vlgmr.msra.gmra.mrb[56].mxu0 %vm318_vm0, %v4369_v25  ;;  %v300_v25 = vld [vmem:[%s4894_s1] sm:$0x3] }
  0xa1   : > { %3965 = vmatprep.mubr.msk.f32.mxu0 %vm318_vm0, %v4378_v31  ;;  %644 = vperm.xlu0 %4144, %v300_v25  }
  0xa4   : > { %3966 = vmatmul.mubr.msk.f32.gmra.mrb[58].mxu0 %vm318_vm0, %v4394_v37 }
  0xa5   : > { %3968 = vmatprep.mubr.msk.f32.mxu0 %vm318_vm0, %v4400_v39 }
  0xa8   : > { %3969 = vmatmul.mubr.msk.f32.gmra.mrb[60].mxu0 %vm318_vm0, %v4406_v40 }
  0xa9   : > { %3971 = vmatprep.mubr.msk.f32.mxu0 %vm318_vm0, %v4422_v51 }
  0xac   : > { %3972 = vmatmul.mubr.msk.f32.gmra.mrb[62].mxu0 %vm318_vm0, %v4437_v63 }
 0x103   : > { %v3726_v31 = vpop.f32.mrb[0].mxu0 }
 0x104   : > { %v412_v37 = vpop.f32.mrb[1].mxu0 }
 0x107   : > { %v3729_v38 = vpop.f32.mrb[2].mxu0 }
 0x108   : > { %v422_v39 = vpop.f32.mrb[3].mxu0 }
 0x10b   : > { %v3732_v41 = vpop.f32.mrb[4].mxu0 }
 0x10c   : > { %v432_v40 = vpop.f32.mrb[5].mxu0 }
 0x10d   : > { %3740 = vmatprep.mubr.msk.f32.mxu1 %vm451_vm5, %v432_v40  ;;  %v652_v40 = vlaneseq }
 0x10e   : > { %3741 = vmatmul.mubr.msk.f32.vlgmr.msra.gmra.mrb[0].mxu1 %vm451_vm5, %v3732_v41 }
 0x10f   : > { %v3735_v42 = vpop.f32.mrb[6].mxu0  ;;  %4001 = vmatpush3.bf16.msra.mxu1 %v4577_v36 }
 0x110   : > { %v442_v43 = vpop.f32.mrb[7].mxu0  ;;  %4003 = vmatprep.subr.bf16.mxu1 %v4561_v33 }
 0x111   : > { %3743 = vmatprep.mubr.msk.f32.mxu1 %vm451_vm5, %v442_v43 }
 0x112   : > { %3744 = vmatmul.mubr.msk.f32.gmra.mrb[2].mxu1 %vm451_vm5, %v3735_v42 }
 0x113   : > { %3750 = vmatprep.mubr.msk.f32.mxu1 %vm451_vm5, %v412_v37  ;;  %v3760_v44 = vpop.f32.mrb[8].mxu0 }
 0x114   : > { %v786_v45 = vpop.f32.mrb[9].mxu0 }
 0x116   : > { %3751 = vmatmul.mubr.msk.f32.vlgmr.msra.gmra.mrb[4].mxu1 %vm451_vm5, %v3726_v31 }
 0x117   : > { %3753 = vmatprep.mubr.msk.f32.mxu1 %vm451_vm5, %v422_v39  ;;  %v3763_v46 = vpop.f32.mrb[10].mxu0  ;;  %4005 = vmatpush3.bf16.msra.mxu1 %v4561_v33  ;;  %v4214_v39 = vmov 1966171168  }
 0x118   : > { %v796_v47 = vpop.f32.mrb[11].mxu0  ;;  %4007 = vmatprep.subr.bf16.mxu1 %v4577_v36  ;;  %v650_v41 = vunpack.c.l.s4 %v4214_v39 }
 0x11a   : > { %3754 = vmatmul.mubr.msk.f32.gmra.mrb[6].mxu1 %vm451_vm5, %v3729_v38  ;;  %v651_v43 = vunpack.c.0.s8 %v650_v41 }
 0x11b   : > { %v3766_v48 = vpop.f32.mrb[12].mxu0 }
 0x11c   : > { %v806_v49 = vpop.f32.mrb[13].mxu0 }
 0x11d   : > { %3774 = vmatprep.mubr.msk.f32.mxu1 %vm451_vm5, %v806_v49 }
 0x11e   : > { %3775 = vmatmul.mubr.msk.f32.vlgmr.msra.gmra.mrb[8].mxu1 %vm451_vm5, %v3766_v48 }
 0x11f   : > { %v3769_v50 = vpop.f32.mrb[14].mxu0  ;;  %4009 = vmatpush3.bf16.msra.mxu1 %v4577_v36 }
 0x120   : > { %v816_v51 = vpop.f32.mrb[15].mxu0  ;;  %4011 = vmatprep.subr.bf16.mxu1 %v4561_v33 }
 0x121   : > { %3777 = vmatprep.mubr.msk.f32.mxu1 %vm451_vm5, %v816_v51 }
 0x122   : > { %3778 = vmatmul.mubr.msk.f32.gmra.mrb[10].mxu1 %vm451_vm5, %v3769_v50 }
 0x123   : > { %3784 = vmatprep.mubr.msk.f32.mxu1 %vm451_vm5, %v786_v45  ;;  %v3794_v52 = vpop.f32.mrb[16].mxu0 }
 0x124   : > { %v1153_v53 = vpop.f32.mrb[17].mxu0 }
 0x126   : > { %3785 = vmatmul.mubr.msk.f32.vlgmr.msra.gmra.mrb[12].mxu1 %vm451_vm5, %v3760_v44  ;;  %v653_v44 = vshrl.u32 %v652_v40, 7 }
 0x127   : > { %3787 = vmatprep.mubr.msk.f32.mxu1 %vm451_vm5, %v796_v47  ;;  %v3797_v54 = vpop.f32.mrb[18].mxu0  ;;  %4013 = vmatpush3.bf16.msra.mxu1 %v4561_v33  ;;  %v4708_v47 = vpop.permute.xlu0 %644 }
 0x128   : > { %v1163_v55 = vpop.f32.mrb[19].mxu0  ;;  %4015 = vmatprep.subr.bf16.mxu1 %v4577_v36  ;;  %v4710_v49 = vsub.s32 %v651_v43, %v653_v44 }
 0x12a   : > { %3788 = vmatmul.mubr.msk.f32.gmra.mrb[14].mxu1 %vm451_vm5, %v3763_v46 }
 0x12b   : > { %v3800_v56 = vpop.f32.mrb[20].mxu0 }
 0x12c   : > { %v1173_v57 = vpop.f32.mrb[21].mxu0 }
 0x12d   : > { %3808 = vmatprep.mubr.msk.f32.mxu1 %vm451_vm5, %v1173_v57 }
 0x12e   : > { %3809 = vmatmul.mubr.msk.f32.vlgmr.msra.gmra.mrb[16].mxu1 %vm451_vm5, %v3800_v56 }
 0x12f   : > { %v3803_v58 = vpop.f32.mrb[22].mxu0  ;;  %4017 = vmatpush3.bf16.msra.mxu1 %v4577_v36 }
 0x130   : > { %v1183_v59 = vpop.f32.mrb[23].mxu0  ;;  %4019 = vmatprep.subr.bf16.mxu1 %v4561_v33 }
 0x131   : > { %3811 = vmatprep.mubr.msk.f32.mxu1 %vm451_vm5, %v1183_v59 }
 0x132   : > { %3812 = vmatmul.mubr.msk.f32.gmra.mrb[18].mxu1 %vm451_vm5, %v3803_v58 }
 0x133   : > { %3818 = vmatprep.mubr.msk.f32.mxu1 %vm451_vm5, %v1153_v53  ;;  %v3828_v60 = vpop.f32.mrb[24].mxu0 }
 0x134   : > { %v1520_v61 = vpop.f32.mrb[25].mxu0 }
 0x136   : > { %3819 = vmatmul.mubr.msk.f32.vlgmr.msra.gmra.mrb[20].mxu1 %vm451_vm5, %v3794_v52 }
 0x137   : > { %3821 = vmatprep.mubr.msk.f32.mxu1 %vm451_vm5, %v1163_v55  ;;  %v3831_v62 = vpop.f32.mrb[26].mxu0  ;;  %4021 = vmatpush3.bf16.msra.mxu1 %v4561_v33 }
 0x138   : > { %v1530_v63 = vpop.f32.mrb[27].mxu0  ;;  %4023 = vmatprep.subr.bf16.mxu1 %v4577_v36 }
 0x13a   : > { %3822 = vmatmul.mubr.msk.f32.gmra.mrb[22].mxu1 %vm451_vm5, %v3797_v54 }
 0x13b   : > { %v3834_v0 = vpop.f32.mrb[28].mxu0 }
 0x13c   : > { %v1540_v1 = vpop.f32.mrb[29].mxu0 }
 0x13d   : > { %3842 = vmatprep.mubr.msk.f32.mxu1 %vm451_vm5, %v1540_v1 }
 0x13e   : > { %3843 = vmatmul.mubr.msk.f32.vlgmr.msra.gmra.mrb[24].mxu1 %vm451_vm5, %v3834_v0 }
 0x13f   : > { %v3837_v2 = vpop.f32.mrb[30].mxu0  ;;  %4025 = vmatpush3.bf16.msra.mxu1 %v4577_v36 }
 0x140   : > { %v1550_v3 = vpop.f32.mrb[31].mxu0  ;;  %4027 = vmatprep.subr.bf16.mxu1 %v4561_v33 }
 0x141   : > { %3845 = vmatprep.mubr.msk.f32.mxu1 %vm451_vm5, %v1550_v3 }
 0x142   : > { %3846 = vmatmul.mubr.msk.f32.gmra.mrb[26].mxu1 %vm451_vm5, %v3837_v2 }
 0x143   : > { %3852 = vmatprep.mubr.msk.f32.mxu1 %vm451_vm5, %v1520_v61  ;;  %v3862_v5 = vpop.f32.mrb[32].mxu0 }
 0x144   : > { %v1887_v6 = vpop.f32.mrb[33].mxu0 }
 0x146   : > { %3853 = vmatmul.mubr.msk.f32.vlgmr.msra.gmra.mrb[28].mxu1 %vm451_vm5, %v3828_v60 }
 0x147   : > { %3855 = vmatprep.mubr.msk.f32.mxu1 %vm451_vm5, %v1530_v63  ;;  %v3865_v7 = vpop.f32.mrb[34].mxu0  ;;  %4029 = vmatpush3.bf16.msra.mxu1 %v4561_v33 }
 0x148   : > { %v1897_v8 = vpop.f32.mrb[35].mxu0  ;;  %4031 = vmatprep.subr.bf16.mxu1 %v4577_v36 }
 0x14a   : > { %3856 = vmatmul.mubr.msk.f32.gmra.mrb[30].mxu1 %vm451_vm5, %v3831_v62 }
 0x14b   : > { %v3868_v9 = vpop.f32.mrb[36].mxu0 }
 0x14c   : > { %v1907_v10 = vpop.f32.mrb[37].mxu0 }
 0x14d   : > { %3876 = vmatprep.mubr.msk.f32.mxu1 %vm451_vm5, %v1907_v10 }
 0x14e   : > { %3877 = vmatmul.mubr.msk.f32.vlgmr.msra.gmra.mrb[32].mxu1 %vm451_vm5, %v3868_v9 }
 0x14f   : > { %v3871_v11 = vpop.f32.mrb[38].mxu0  ;;  %4033 = vmatpush3.bf16.msra.mxu1 %v4577_v36 }
 0x150   : > { %v1917_v12 = vpop.f32.mrb[39].mxu0  ;;  %4035 = vmatprep.subr.bf16.mxu1 %v4561_v33 }
 0x151   : > { %3879 = vmatprep.mubr.msk.f32.mxu1 %vm451_vm5, %v1917_v12 }
 0x152   : > { %3880 = vmatmul.mubr.msk.f32.gmra.mrb[34].mxu1 %vm451_vm5, %v3871_v11 }
 0x153   : > { %3886 = vmatprep.mubr.msk.f32.mxu1 %vm451_vm5, %v1887_v6  ;;  %v3896_v13 = vpop.f32.mrb[40].mxu0 }
 0x154   : > { %v2254_v14 = vpop.f32.mrb[41].mxu0 }
 0x156   : > { %3887 = vmatmul.mubr.msk.f32.vlgmr.msra.gmra.mrb[36].mxu1 %vm451_vm5, %v3862_v5 }
 0x157   : > { %3889 = vmatprep.mubr.msk.f32.mxu1 %vm451_vm5, %v1897_v8  ;;  %v3899_v15 = vpop.f32.mrb[42].mxu0  ;;  %4037 = vmatpush3.bf16.msra.mxu1 %v4561_v33 }
 0x158   : > { %v2264_v16 = vpop.f32.mrb[43].mxu0  ;;  %4039 = vmatprep.subr.bf16.mxu1 %v4577_v36 }
 0x15a   : > { %3890 = vmatmul.mubr.msk.f32.gmra.mrb[38].mxu1 %vm451_vm5, %v3865_v7 }
 0x15b   : > { %v3902_v17 = vpop.f32.mrb[44].mxu0 }
 0x15c   : > { %v2274_v18 = vpop.f32.mrb[45].mxu0 }
 0x15d   : > { %3910 = vmatprep.mubr.msk.f32.mxu1 %vm451_vm5, %v2274_v18 }
 0x15e   : > { %3911 = vmatmul.mubr.msk.f32.vlgmr.msra.gmra.mrb[40].mxu1 %vm451_vm5, %v3902_v17 }
 0x15f   : > { %v3905_v19 = vpop.f32.mrb[46].mxu0  ;;  %4041 = vmatpush3.bf16.msra.mxu1 %v4577_v36 }
 0x160   : > { %v2284_v20 = vpop.f32.mrb[47].mxu0  ;;  %4043 = vmatprep.subr.bf16.mxu1 %v4561_v33 }
 0x161   : > { %3913 = vmatprep.mubr.msk.f32.mxu1 %vm451_vm5, %v2284_v20 }
 0x162   : > { %3914 = vmatmul.mubr.msk.f32.gmra.mrb[42].mxu1 %vm451_vm5, %v3905_v19 }
 0x163   : > { %3920 = vmatprep.mubr.msk.f32.mxu1 %vm451_vm5, %v2254_v14  ;;  %v3930_v21 = vpop.f32.mrb[48].mxu0 }
 0x164   : > { %v2621_v22 = vpop.f32.mrb[49].mxu0 }
 0x166   : > { %3921 = vmatmul.mubr.msk.f32.vlgmr.msra.gmra.mrb[44].mxu1 %vm451_vm5, %v3896_v13 }
 0x167   : > { %3923 = vmatprep.mubr.msk.f32.mxu1 %vm451_vm5, %v2264_v16  ;;  %v3933_v23 = vpop.f32.mrb[50].mxu0  ;;  %4045 = vmatpush3.bf16.msra.mxu1 %v4561_v33 }
 0x168   : > { %v2631_v24 = vpop.f32.mrb[51].mxu0  ;;  %4047 = vmatprep.subr.bf16.mxu1 %v4577_v36 }
 0x16a   : > { %3924 = vmatmul.mubr.msk.f32.gmra.mrb[46].mxu1 %vm451_vm5, %v3899_v15 }
 0x16b   : > { %v3936_v26 = vpop.f32.mrb[52].mxu0 }
 0x16c   : > { %v2641_v27 = vpop.f32.mrb[53].mxu0 }
 0x16d   : > { %3944 = vmatprep.mubr.msk.f32.mxu1 %vm451_vm5, %v2641_v27 }
 0x16e   : > { %3945 = vmatmul.mubr.msk.f32.vlgmr.msra.gmra.mrb[48].mxu1 %vm451_vm5, %v3936_v26 }
 0x16f   : > { %v3939_v28 = vpop.f32.mrb[54].mxu0  ;;  %4049 = vmatpush3.bf16.msra.mxu1 %v4577_v36 }
 0x170   : > { %v2651_v29 = vpop.f32.mrb[55].mxu0  ;;  %4051 = vmatprep.subr.bf16.mxu1 %v4561_v33 }
 0x171   : > { %3947 = vmatprep.mubr.msk.f32.mxu1 %vm451_vm5, %v2651_v29 }
 0x172   : > { %3948 = vmatmul.mubr.msk.f32.gmra.mrb[50].mxu1 %vm451_vm5, %v3939_v28 }
 0x173   : > { %3954 = vmatprep.mubr.msk.f32.mxu1 %vm451_vm5, %v2621_v22  ;;  %v3964_v30 = vpop.f32.mrb[56].mxu0 }
 0x174   : > { %v2988_v32 = vpop.f32.mrb[57].mxu0 }
 0x176   : > { %3955 = vmatmul.mubr.msk.f32.vlgmr.msra.gmra.mrb[52].mxu1 %vm451_vm5, %v3930_v21 }
 0x177   : > { %3957 = vmatprep.mubr.msk.f32.mxu1 %vm451_vm5, %v2631_v24  ;;  %v3967_v34 = vpop.f32.mrb[58].mxu0  ;;  %4053 = vmatpush3.bf16.msra.mxu1 %v4561_v33 }
 0x178   : > { %v2998_v35 = vpop.f32.mrb[59].mxu0  ;;  %4055 = vmatprep.subr.bf16.mxu1 %v4577_v36 }
 0x17a   : > { %3958 = vmatmul.mubr.msk.f32.gmra.mrb[54].mxu1 %vm451_vm5, %v3933_v23 }
 0x17b   : > { %v3970_v4 = vpop.f32.mrb[60].mxu0 }
 0x17c   : > { %v3008_v25 = vpop.f32.mrb[61].mxu0 }
 0x17d   : > { %3978 = vmatprep.mubr.msk.f32.mxu1 %vm451_vm5, %v3008_v25 }
 0x17e   : > { %3979 = vmatmul.mubr.msk.f32.vlgmr.msra.gmra.mrb[56].mxu1 %vm451_vm5, %v3970_v4 }
 0x17f   : > { %v3973_v31 = vpop.f32.mrb[62].mxu0  ;;  %4057 = vmatpush3.bf16.msra.mxu1 %v4577_v36 }
 0x180   : > { %v3018_v37 = vpop.f32.mrb[63].mxu0 }
 0x181   : > { %3981 = vmatprep.mubr.msk.f32.mxu1 %vm451_vm5, %v3018_v37 }
 0x182   : > { %3982 = vmatmul.mubr.msk.f32.gmra.mrb[58].mxu1 %vm451_vm5, %v3973_v31 }
 0x183   : > { %3988 = vmatprep.mubr.msk.f32.mxu1 %vm451_vm5, %v2988_v32 }
 0x186   : > { %3989 = vmatmul.mubr.msk.f32.vlgmr.msra.gmra.mrb[60].mxu1 %vm451_vm5, %v3964_v30 }
 0x187   : > { %3991 = vmatprep.mubr.msk.f32.mxu1 %vm451_vm5, %v2998_v35 }
 0x18a   : > { %3992 = vmatmul.mubr.msk.f32.gmra.mrb[62].mxu1 %vm451_vm5, %v3967_v34 }
 0x1e1   : > { %v3742_v33 = vpop.f32.mrb[0].mxu1 }
 0x1e2   : > { %v530_v38 = vpop.f32.mrb[1].mxu1 }
 0x1e5   : > { %v3745_v42 = vpop.f32.mrb[2].mxu1 }
 0x1e6   : > { %v539_v36 = vpop.f32.mrb[3].mxu1 }
 0x1e9   : > { %v3752_v45 = vpop.f32.mrb[4].mxu1 }
 0x1ea   : > { %v625_v46 = vpop.f32.mrb[5].mxu1 }
 0x1eb   : > { %v626_v48 = vadd.f32 %v625_v46, %v530_v38 }
 0x1ed   : > { %v647_v50 = vadd.f32 %v4708_v47, %v626_v48  ;;  %v3755_v51 = vpop.f32.mrb[6].mxu1 }
 0x1ee   : > { %v634_v52 = vpop.f32.mrb[7].mxu1 }
 0x1ef   : > { %v655_v53 = vrot.slane %v647_v50, %v4710_v49  ;;  %v635_v54 = vadd.f32 %v634_v52, %v539_v36 }
 0x1f1   : > { %v656_v55 = vcombine.high %v655_v53, %v655_v53  ;;  %v663_v56 = vrot.slane %v655_v53, %v4710_v49  ;;  %v676_v57 = vadd.f32 %v4708_v47, %v635_v54  ;;  %v3776_v58 = vpop.f32.mrb[8].mxu1 }
 0x1f2   : > { %v903_v59 = vpop.f32.mrb[9].mxu1 }
 0x1f3   : > { %v670_v60 = vrot.slane %v656_v55, %v4710_v49  ;;  %674 = vst.msk [vmem:[%s4718_s14] sm:$0x1] %vm673_vm6, %v663_v56  ;;  %v684_v61 = vrot.slane %v676_v57, %v4710_v49 }
 0x1f5   : > { %675 = vst.msk [vmem:[%s4718_s14 + $0x10] sm:$0x1] %vm673_vm6, %v670_v60  ;;  %v685_v62 = vcombine.high %v684_v61, %v684_v61  ;;  %v692_v63 = vrot.slane %v684_v61, %v4710_v49  ;;  %v3779_v0 = vpop.f32.mrb[10].mxu1 }
 0x1f6   : > { %v912_v1 = vpop.f32.mrb[11].mxu1 }
 0x1f7   : > { %v699_v2 = vrot.slane %v685_v62, %v4710_v49  ;;  %702 = vst.msk [vmem:[%s4718_s14 + $0x1] sm:$0x1] %vm673_vm6, %v692_v63 }
 0x1f9   : > { %703 = vst.msk [vmem:[%s4718_s14 + $0x11] sm:$0x1] %vm673_vm6, %v699_v2  ;;  %v3786_v3 = vpop.f32.mrb[12].mxu1 }
 0x1fa   : > { %v998_v5 = vpop.f32.mrb[13].mxu1 }
 0x1fb   : > { %v999_v6 = vadd.f32 %v998_v5, %v903_v59 }
 0x1fd   : > { %v1015_v7 = vadd.f32 %v999_v6, %v4708_v47  ;;  %v3789_v8 = vpop.f32.mrb[14].mxu1 }
 0x1fe   : > { %v1007_v9 = vpop.f32.mrb[15].mxu1 }
 0x1ff   : > { %v1023_v10 = vrot.slane %v1015_v7, %v4710_v49  ;;  %v1008_v11 = vadd.f32 %v1007_v9, %v912_v1 }
 0x201   : > { %v1024_v12 = vcombine.high %v1023_v10, %v1023_v10  ;;  %v1031_v13 = vrot.slane %v1023_v10, %v4710_v49  ;;  %v1043_v14 = vadd.f32 %v1008_v11, %v4708_v47  ;;  %v3810_v15 = vpop.f32.mrb[16].mxu1 }
 0x202   : > { %v1270_v16 = vpop.f32.mrb[17].mxu1 }
 0x203   : > { %v1038_v17 = vrot.slane %v1024_v12, %v4710_v49  ;;  %1041 = vst.msk [vmem:[%s4718_s14 + $0x2] sm:$0x1] %vm673_vm6, %v1031_v13  ;;  %v1051_v18 = vrot.slane %v1043_v14, %v4710_v49 }
 0x205   : > { %1042 = vst.msk [vmem:[%s4718_s14 + $0x12] sm:$0x1] %vm673_vm6, %v1038_v17  ;;  %v1052_v19 = vcombine.high %v1051_v18, %v1051_v18  ;;  %v1059_v20 = vrot.slane %v1051_v18, %v4710_v49  ;;  %v3813_v21 = vpop.f32.mrb[18].mxu1 }
 0x206   : > { %v1279_v22 = vpop.f32.mrb[19].mxu1 }
 0x207   : > { %v1066_v23 = vrot.slane %v1052_v19, %v4710_v49  ;;  %1069 = vst.msk [vmem:[%s4718_s14 + $0x3] sm:$0x1] %vm673_vm6, %v1059_v20 }
 0x209   : > { %1070 = vst.msk [vmem:[%s4718_s14 + $0x13] sm:$0x1] %vm673_vm6, %v1066_v23  ;;  %v3820_v24 = vpop.f32.mrb[20].mxu1 }
 0x20a   : > { %v1365_v26 = vpop.f32.mrb[21].mxu1 }
 0x20b   : > { %v1366_v27 = vadd.f32 %v1365_v26, %v1270_v16 }
 0x20d   : > { %v1382_v28 = vadd.f32 %v1366_v27, %v4708_v47  ;;  %v3823_v29 = vpop.f32.mrb[22].mxu1 }
 0x20e   : > { %v1374_v30 = vpop.f32.mrb[23].mxu1 }
 0x20f   : > { %v1390_v32 = vrot.slane %v1382_v28, %v4710_v49  ;;  %v1375_v34 = vadd.f32 %v1374_v30, %v1279_v22 }
 0x211   : > { %v1391_v35 = vcombine.high %v1390_v32, %v1390_v32  ;;  %v1398_v4 = vrot.slane %v1390_v32, %v4710_v49  ;;  %v1410_v25 = vadd.f32 %v1375_v34, %v4708_v47  ;;  %v3844_v31 = vpop.f32.mrb[24].mxu1 }
 0x212   : > { %v1637_v37 = vpop.f32.mrb[25].mxu1 }
 0x213   : > { %v1405_v33 = vrot.slane %v1391_v35, %v4710_v49  ;;  %1408 = vst.msk [vmem:[%s4718_s14 + $0x4] sm:$0x1] %vm673_vm6, %v1398_v4  ;;  %v1418_v38 = vrot.slane %v1410_v25, %v4710_v49 }
 0x215   : > { %1409 = vst.msk [vmem:[%s4718_s14 + $0x14] sm:$0x1] %vm673_vm6, %v1405_v33  ;;  %v1419_v39 = vcombine.high %v1418_v38, %v1418_v38  ;;  %v1426_v41 = vrot.slane %v1418_v38, %v4710_v49  ;;  %v3847_v40 = vpop.f32.mrb[26].mxu1 }
 0x216   : > { %v1646_v42 = vpop.f32.mrb[27].mxu1 }
 0x217   : > { %v1433_v36 = vrot.slane %v1419_v39, %v4710_v49  ;;  %1436 = vst.msk [vmem:[%s4718_s14 + $0x5] sm:$0x1] %vm673_vm6, %v1426_v41 }
 0x219   : > { %1437 = vst.msk [vmem:[%s4718_s14 + $0x15] sm:$0x1] %vm673_vm6, %v1433_v36  ;;  %v3854_v43 = vpop.f32.mrb[28].mxu1 }
 0x21a   : > { %v1732_v44 = vpop.f32.mrb[29].mxu1 }
 0x21b   : > { %v1733_v45 = vadd.f32 %v1732_v44, %v1637_v37 }
 0x21d   : > { %v1749_v46 = vadd.f32 %v1733_v45, %v4708_v47  ;;  %v3857_v48 = vpop.f32.mrb[30].mxu1 }
 0x21e   : > { %v1741_v50 = vpop.f32.mrb[31].mxu1 }
 0x21f   : > { %v1757_v51 = vrot.slane %v1749_v46, %v4710_v49  ;;  %v1742_v52 = vadd.f32 %v1741_v50, %v1646_v42 }
 0x221   : > { %v1758_v53 = vcombine.high %v1757_v51, %v1757_v51  ;;  %v1765_v54 = vrot.slane %v1757_v51, %v4710_v49  ;;  %v1777_v55 = vadd.f32 %v1742_v52, %v4708_v47  ;;  %v3878_v56 = vpop.f32.mrb[32].mxu1 }
 0x222   : > { %v2004_v57 = vpop.f32.mrb[33].mxu1 }
 0x223   : > { %v1772_v58 = vrot.slane %v1758_v53, %v4710_v49  ;;  %1775 = vst.msk [vmem:[%s4718_s14 + $0x6] sm:$0x1] %vm673_vm6, %v1765_v54  ;;  %v1785_v59 = vrot.slane %v1777_v55, %v4710_v49 }
 0x225   : > { %1776 = vst.msk [vmem:[%s4718_s14 + $0x16] sm:$0x1] %vm673_vm6, %v1772_v58  ;;  %v1786_v60 = vcombine.high %v1785_v59, %v1785_v59  ;;  %v1793_v61 = vrot.slane %v1785_v59, %v4710_v49  ;;  %v3881_v62 = vpop.f32.mrb[34].mxu1 }
 0x226   : > { %v2013_v63 = vpop.f32.mrb[35].mxu1 }
 0x227   : > { %v1800_v0 = vrot.slane %v1786_v60, %v4710_v49  ;;  %1803 = vst.msk [vmem:[%s4718_s14 + $0x7] sm:$0x1] %vm673_vm6, %v1793_v61 }
 0x229   : > { %1804 = vst.msk [vmem:[%s4718_s14 + $0x17] sm:$0x1] %vm673_vm6, %v1800_v0  ;;  %v3888_v1 = vpop.f32.mrb[36].mxu1 }
 0x22a   : > { %v2099_v2 = vpop.f32.mrb[37].mxu1 }
 0x22b   : > { %v2100_v3 = vadd.f32 %v2099_v2, %v2004_v57 }
 0x22d   : > { %v2116_v5 = vadd.f32 %v2100_v3, %v4708_v47  ;;  %v3891_v6 = vpop.f32.mrb[38].mxu1 }
 0x22e   : > { %v2108_v7 = vpop.f32.mrb[39].mxu1 }
 0x22f   : > { %v2124_v8 = vrot.slane %v2116_v5, %v4710_v49  ;;  %v2109_v9 = vadd.f32 %v2108_v7, %v2013_v63 }
 0x231   : > { %v2125_v10 = vcombine.high %v2124_v8, %v2124_v8  ;;  %v2132_v11 = vrot.slane %v2124_v8, %v4710_v49  ;;  %v2144_v12 = vadd.f32 %v2109_v9, %v4708_v47  ;;  %v3912_v13 = vpop.f32.mrb[40].mxu1 }
 0x232   : > { %v2371_v14 = vpop.f32.mrb[41].mxu1 }
 0x233   : > { %v2139_v15 = vrot.slane %v2125_v10, %v4710_v49  ;;  %2142 = vst.msk [vmem:[%s4718_s14 + $0x8] sm:$0x1] %vm673_vm6, %v2132_v11  ;;  %v2152_v16 = vrot.slane %v2144_v12, %v4710_v49 }
 0x235   : > { %2143 = vst.msk [vmem:[%s4718_s14 + $0x18] sm:$0x1] %vm673_vm6, %v2139_v15  ;;  %v2153_v17 = vcombine.high %v2152_v16, %v2152_v16  ;;  %v2160_v18 = vrot.slane %v2152_v16, %v4710_v49  ;;  %v3915_v19 = vpop.f32.mrb[42].mxu1 }
 0x236   : > { %v2380_v20 = vpop.f32.mrb[43].mxu1 }
 0x237   : > { %v2167_v21 = vrot.slane %v2153_v17, %v4710_v49  ;;  %2170 = vst.msk [vmem:[%s4718_s14 + $0x9] sm:$0x1] %vm673_vm6, %v2160_v18 }
 0x239   : > { %2171 = vst.msk [vmem:[%s4718_s14 + $0x19] sm:$0x1] %vm673_vm6, %v2167_v21  ;;  %v3922_v22 = vpop.f32.mrb[44].mxu1 }
 0x23a   : > { %v2466_v23 = vpop.f32.mrb[45].mxu1 }
 0x23b   : > { %v2467_v24 = vadd.f32 %v2466_v23, %v2371_v14 }
 0x23d   : > { %v2483_v26 = vadd.f32 %v2467_v24, %v4708_v47  ;;  %v3925_v27 = vpop.f32.mrb[46].mxu1 }
 0x23e   : > { %v2475_v28 = vpop.f32.mrb[47].mxu1 }
 0x23f   : > { %v2491_v29 = vrot.slane %v2483_v26, %v4710_v49  ;;  %v2476_v30 = vadd.f32 %v2475_v28, %v2380_v20 }
 0x241   : > { %v2492_v32 = vcombine.high %v2491_v29, %v2491_v29  ;;  %v2499_v34 = vrot.slane %v2491_v29, %v4710_v49  ;;  %v2511_v35 = vadd.f32 %v2476_v30, %v4708_v47  ;;  %v3946_v4 = vpop.f32.mrb[48].mxu1 }
 0x242   : > { %v2738_v25 = vpop.f32.mrb[49].mxu1 }
 0x243   : > { %v2506_v31 = vrot.slane %v2492_v32, %v4710_v49  ;;  %2509 = vst.msk [vmem:[%s4718_s14 + $0xa] sm:$0x1] %vm673_vm6, %v2499_v34  ;;  %v2519_v37 = vrot.slane %v2511_v35, %v4710_v49 }
 0x245   : > { %2510 = vst.msk [vmem:[%s4718_s14 + $0x1a] sm:$0x1] %vm673_vm6, %v2506_v31  ;;  %v2520_v33 = vcombine.high %v2519_v37, %v2519_v37  ;;  %v2527_v38 = vrot.slane %v2519_v37, %v4710_v49  ;;  %v3949_v39 = vpop.f32.mrb[50].mxu1 }
 0x246   : > { %v2747_v41 = vpop.f32.mrb[51].mxu1 }
 0x247   : > { %v2534_v40 = vrot.slane %v2520_v33, %v4710_v49  ;;  %2537 = vst.msk [vmem:[%s4718_s14 + $0xb] sm:$0x1] %vm673_vm6, %v2527_v38 }
 0x249   : > { %2538 = vst.msk [vmem:[%s4718_s14 + $0x1b] sm:$0x1] %vm673_vm6, %v2534_v40  ;;  %v3956_v42 = vpop.f32.mrb[52].mxu1 }
 0x24a   : > { %v2833_v36 = vpop.f32.mrb[53].mxu1 }
 0x24b   : > { %v2834_v43 = vadd.f32 %v2833_v36, %v2738_v25 }
 0x24d   : > { %v2850_v44 = vadd.f32 %v2834_v43, %v4708_v47  ;;  %v3959_v45 = vpop.f32.mrb[54].mxu1 }
 0x24e   : > { %v2842_v46 = vpop.f32.mrb[55].mxu1 }
 0x24f   : > { %v2858_v48 = vrot.slane %v2850_v44, %v4710_v49  ;;  %v2843_v50 = vadd.f32 %v2842_v46, %v2747_v41 }
 0x251   : > { %v2859_v51 = vcombine.high %v2858_v48, %v2858_v48  ;;  %v2866_v52 = vrot.slane %v2858_v48, %v4710_v49  ;;  %v2878_v53 = vadd.f32 %v2843_v50, %v4708_v47  ;;  %v3980_v54 = vpop.f32.mrb[56].mxu1 }
 0x252   : > { %v3105_v55 = vpop.f32.mrb[57].mxu1 }
 0x253   : > { %v2873_v56 = vrot.slane %v2859_v51, %v4710_v49  ;;  %2876 = vst.msk [vmem:[%s4718_s14 + $0xc] sm:$0x1] %vm673_vm6, %v2866_v52  ;;  %v2886_v57 = vrot.slane %v2878_v53, %v4710_v49 }
 0x255   : > { %2877 = vst.msk [vmem:[%s4718_s14 + $0x1c] sm:$0x1] %vm673_vm6, %v2873_v56  ;;  %v2887_v58 = vcombine.high %v2886_v57, %v2886_v57  ;;  %v2894_v59 = vrot.slane %v2886_v57, %v4710_v49  ;;  %v3983_v60 = vpop.f32.mrb[58].mxu1 }
 0x256   : > { %v3114_v61 = vpop.f32.mrb[59].mxu1 }
 0x257   : > { %v2901_v62 = vrot.slane %v2887_v58, %v4710_v49  ;;  %2904 = vst.msk [vmem:[%s4718_s14 + $0xd] sm:$0x1] %vm673_vm6, %v2894_v59 }
 0x259   : > { %2905 = vst.msk [vmem:[%s4718_s14 + $0x1d] sm:$0x1] %vm673_vm6, %v2901_v62  ;;  %v3990_v63 = vpop.f32.mrb[60].mxu1 }
 0x25a   : > { %v3200_v0 = vpop.f32.mrb[61].mxu1 }
 0x25b   : > { %v3201_v1 = vadd.f32 %v3200_v0, %v3105_v55 }
 0x25d   : > { %v3217_v2 = vadd.f32 %v3201_v1, %v4708_v47  ;;  %v3993_v3 = vpop.f32.mrb[62].mxu1 }
 0x25e   : > { %v3209_v5 = vpop.f32.mrb[63].mxu1 }
 0x25f   : > { %v3225_v6 = vrot.slane %v3217_v2, %v4710_v49  ;;  %v3210_v7 = vadd.f32 %v3209_v5, %v3114_v61 }
 0x261   : > { %v3226_v8 = vcombine.high %v3225_v6, %v3225_v6  ;;  %v3233_v9 = vrot.slane %v3225_v6, %v4710_v49  ;;  %v3245_v10 = vadd.f32 %v3210_v7, %v4708_v47 }
 0x263   : > { %v3240_v11 = vrot.slane %v3226_v8, %v4710_v49  ;;  %3243 = vst.msk [vmem:[%s4718_s14 + $0xe] sm:$0x1] %vm673_vm6, %v3233_v9  ;;  %v3253_v12 = vrot.slane %v3245_v10, %v4710_v49 }
 0x265   : > { %3244 = vst.msk [vmem:[%s4718_s14 + $0x1e] sm:$0x1] %vm673_vm6, %v3240_v11  ;;  %v3254_v13 = vcombine.high %v3253_v12, %v3253_v12  ;;  %v3261_v14 = vrot.slane %v3253_v12, %v4710_v49 }
 0x267   : > { %v3268_v15 = vrot.slane %v3254_v13, %v4710_v49  ;;  %3271 = vst.msk [vmem:[%s4718_s14 + $0xf] sm:$0x1] %vm673_vm6, %v3261_v14 }
 0x269   : > { %3272 = vst.msk [vmem:[%s4718_s14 + $0x1f] sm:$0x1] %vm673_vm6, %v3268_v15 }
 0x26a   : > { %s3549_s30 = sshll.u32 %s4195_s21, 1  ;;  %s3550_s9 = sshll.u32 %s4199_s22, 3 }
 0x26b   : > { %s3286_s10 = sadd.s32 %s3550_s9, %s3549_s30  ;;  %s3305_s11 = sshll.u32 %s4718_s14, 4  ;;  %s3306_s11 = int_to_ptr.vmem [resolvable:$true] %s3305_s11 }
 0x26c   : > { %s3551_s15 = sshll.u32 %s3286_s10, 7  ;;  %s4215_s26 = smov 256  }
 0x26d   : > { %s3288_s6 = scalar_lea.hbm %s4898_s5, %s3551_s15  ;;  %4058 = sst [smem:[#allocation6]] (%p4312_p8), %s4215_s26 }
 0x26e   : > { %s4216_s27 = smov 512   ;;  %s4217_s0 = smov 2  }
 0x26f   : > { %4059 = sst [smem:[#allocation6 + $0x1]] (%p4312_p8), %s4216_s27  ;;  %s4218_s21 = smov 128  }
 0x270   : > { %4060 = sst [smem:[#allocation6 + $0x2]] (%p4312_p8), %s4217_s0  ;;  %s4219_s22 = smov 8  }
 0x271   : > { %4061 = sst [smem:[#allocation6 + $0x3]] (%p4312_p8), %s4218_s21  ;;  %s4220_s14 = smov [#allocation5]  }
 0x272   : > { %4062 = sst [smem:[#allocation6 + $0x4]] (%p4312_p8), %s4218_s21  ;;  %s4221_s30 = smov 0  }
 0x273   : > { %4063 = sst [smem:[#allocation6 + $0x5]] (%p4312_p8), %s4219_s22 }
 0x274   : > { %4064 = dma.general (%p4312_p8), %s3306_s11, 512, %s3288_s6, %s3274_s13, %s4220_s14, [#allocation6], %s4221_s30, 0  }
 0x275 PF: > { %p4070_p1 = scmp.ge.s32.totalorder %s4211_s25, 2  ;;  %s3333_s9 = sand.u32 1, %s4183_s18  }
 0x276   : > { %s3334_s0 = scalar_lea.sflag [#allocation4], %s3333_s9 }
 0x277   : > { %p4067_p2 = pnand %p4070_p1, %p4316_p9 }
 0x279   : > { %4178 = dma.done.wait (!%p4067_p2), %s3334_s0, 512  }
 0x27a   : > { %4180 = vsyncadd (!%p4067_p2), %s3334_s0, 4294966784  ;;  %s18_s25 = sadd.s32 1, %s4211_s25   ;;  %s4904_s18 = smov %s4187_s19 }
 0x27b   : > { %p15_p3 = scmp.ge.s32.totalorder %s18_s25, 6   ;;  %s4905_s19 = smov %s4191_s20 }
 0x27c   : > { %s4906_s20 = smov %s4324_s12  ;;  %s4907_s21 = smov %s4203_s23 }
 0x27d   : > { %s4908_s22 = smov %s4207_s24  ;;  %s4909_s23 = smov %s4912_s28 }
 0x27e   : > { %s4910_s24 = smov %s4916_s29  ;;  %17 = sbr.rel (!%p15_p3) target bundleno = 7 (0x7), region = 123 }
 0x285   :  { %3339 = vsyncpa [#allocation4], 1 }
 0x286   :  { %3341 = vsyncpa [#allocation4 + $0x1], 1 }

// kernel: tile.0
= control target key start
LH: loop header
LB: loop body
LE: loop exit
PB: predicated region body
PF: predicated region fallthrough
CT: control target
= control target key end

     0   :  { %vm7_vm0 = vcmask 7168   ;;  %s37_s0 = inlined_call_operand.vmem [shape: f32[4,2], index: 0, kind: input, shape index: {}]   ;;  %s38_s1 = inlined_call_operand.vmem [shape: f32[8,1], index: 1, kind: output, shape index: {}]  }
   0x1   :  { %v4_v0 = vld [vmem:[%s37_s0] sm:$0xf]  ;;  %s17_s0 = smov 127  }
   0x2   :  { %5 = vst [vmem:[#allocation0] sm:$0xf] %v4_v0 }
   0x9   :  { %v9_v1 = vld [vmem:[#allocation0] sm:$0xf]  }
   0xa   :  { %v6_v2 = vld [vmem:[#allocation0] sm:$0xf]   ;;  %10 = vrot.lane.b32.xlu0 %v9_v1, %s17_s0 }
   0xb   :  { %8 = vst.msk [vmem:[%s38_s1] ss:$2 sm:$0xf] %vm7_vm0, %v6_v2  }
  0x7c   :  { %v11_v3 = vpop.permute.xlu0 %10  }
  0x7d   :  { %15 = vst.msk [vmem:[%s38_s1 + $0x1] ss:$2 sm:$0xf] %vm7_vm0, %v11_v3  }

// kernel: tile.8
= control target key start
LH: loop header
LB: loop body
LE: loop exit
PB: predicated region body
PF: predicated region fallthrough
CT: control target
= control target key end

     0   :  { %s22_s0 = inlined_call_operand.vmem [shape: f32[2], index: 0, kind: input, shape index: {}]   ;;  %s23_s1 = inlined_call_operand.vmem [shape: f32[4,2], index: 1, kind: output, shape index: {}]  }
   0x1   :  { %v4_v0 = vld [vmem:[%s22_s0] ss:$0 sm:$0xff] }
   0x2   :  { %5 = vst [vmem:[%s23_s1] sm:$0xf] %v4_v0 }

// kernel: _upsample_fallback.1
= control target key start
LH: loop header
LB: loop body
LE: loop exit
PB: predicated region body
PF: predicated region fallthrough
CT: control target
= control target key end

     0   :  { %s500_s12 = smov 0   ;;  %s502_s13 = smov 0   ;;  %s545_s0 = inlined_call_operand.vmem [shape: f32[16,4], index: 0, kind: input, shape index: {}]   ;;  %s546_s1 = inlined_call_operand.vmem [shape: f32[16,1], index: 1, kind: input, shape index: {}]   ;;  %s547_s2 = inlined_call_operand.vmem [shape: f32[2,4,256], index: 2, kind: input, shape index: {}]   ;;  %s548_s3 = inlined_call_operand.vmem [shape: f32[2,16,256], index: 3, kind: output, shape index: {}]  }
   0x1   :  { %s504_s14 = smov 0  }
   0x2 LB: > { %s25_s15 = sadd.s32 1, %s472_s13  ;;  %p411_p0 = scmp.ge.s32.totalorder %s476_s14, 1  ;;  %s476_s14 = sphi %s504_s14, %s13_s14   ;;  %s472_s13 = sphi %s502_s13, %s550_s13   ;;  %s468_s12 = sphi %s500_s12, %s549_s12  }
   0x3   : > { %p27_p1 = scmp.ge.s32.totalorder %s25_s15, 2  ;;  %p158_p2 = scmp.lt.s32.totalorder %s476_s14, 3 }
   0x5   : > { %s552_s15 = smov (%p27_p1, %s25_s15), 0  ;;  %p159_p3 = pnand %p411_p0, %p158_p2 }
   0x6   : > { %p191_p4 = scmp.lt.s32.totalorder (!%p159_p3), %s468_s12, 1  ;;  %v478_v0 = vmov (!%p159_p3), 0.0   ;;  %v213_v1 = vld [vmem:[%s546_s1] sm:$0xff] (!%p159_p3)  ;;  %v479_v2 = vmov (!%p159_p3), 0   ;;  %v214_v3 = vld [vmem:[%s546_s1 + $0x8] sm:$0xff] (!%p159_p3)  ;;  %vm234_vm0 = vcmask (!%p159_p3), 1043456  }
   0x7   : > { %162 = sbr.rel (%p159_p3) target bundleno = 238 (0xee), region = 32  ;;  %303 = vmatprep.mubr.f32.mxu0 (!%p159_p3), %v478_v0  ;;  %309 = vmatprep.mubr.f32.mxu1 (!%p159_p3), %v478_v0  ;;  %v210_v6 = vld [vmem:[%s545_s0] sm:$0xff] (!%p159_p3)  ;;  %vm227_vm1 = vcmask (!%p159_p3), 31744   ;;  %v211_v7 = vld [vmem:[%s545_s0 + $0x8] sm:$0xff] (!%p159_p3) }
   0x8   : > { %452 = vset.pattern.permute.xlu0 (!%p159_p3), %v479_v2 }
   0x9   : > { %217 = vperm.xlu0 (!%p159_p3), %452, %v213_v1  }
   0xd   : > { %222 = vperm.xlu0 (!%p159_p3), %452, %v214_v3  }
   0xe   : > { %s554_s12 = smov (!%p191_p4, %s468_s12), 1 }
   0xf   : > { %s422_s18 = sshll.u32 %s554_s12, 3  ;;  %s423_s28 = sshll.u32 %s554_s12, 5 }
  0x10   : > { %s198_s23 = scalar_lea.vmem %s547_s2, %s422_s18  ;;  %s208_s4 = scalar_lea.vmem %s548_s3, %s423_s28 }
  0x11   : > { %v212_v4 = vld [vmem:[%s198_s23] sm:$0xff] }
  0x12   : > { %v226_v5 = vcombine.high %v212_v4, %v212_v4 }
  0x14   : > { %416 = vmatprep.subr.msk.mxu0 %vm234_vm0, %v226_v5  ;;  %424 = vmatprep.subr.msk.mxu1 %vm234_vm0, %v226_v5 }
  0x15   : > { %417 = vmatpush1.msk.msra.mxu0 %vm234_vm0, %v212_v4  ;;  %425 = vmatpush1.msk.msra.mxu1 %vm234_vm0, %v212_v4 }
  0x16   : > { %418 = vmatmul.mubr.msk.f32.vlgmr.msra.gmra.mrb[0].mxu0 %vm227_vm1, %v210_v6  ;;  %419 = vmatmul.mubr.msk.f32.vlgmr.msra.gmra.mrb[0].mxu1 %vm227_vm1, %v211_v7 }
  0x88   : > { %v218_v8 = vpop.permute.xlu0 %217 }
  0x8c   : > { %v223_v9 = vpop.permute.xlu0 %222 }
  0xe9   : > { %v305_v10 = vpop.f32.mrb[0].mxu0  ;;  %v311_v11 = vpop.f32.mrb[0].mxu1 }
  0xea   : > { %v306_v12 = vadd.f32 %v305_v10, %v218_v8  ;;  %v312_v13 = vadd.f32 %v311_v11, %v223_v9  ;;  %v307_v14 = vpop.f32.mrb[1].mxu0  ;;  %v313_v15 = vpop.f32.mrb[1].mxu1 }
  0xeb   : > { %v308_v16 = vadd.f32 %v307_v14, %v218_v8  ;;  %v314_v17 = vadd.f32 %v313_v15, %v223_v9 }
  0xec   : > { %316 = vst [vmem:[%s208_s4] sm:$0xff] %v306_v12  ;;  %318 = vst [vmem:[%s208_s4 + $0x10] sm:$0xff] %v312_v13 }
  0xed   : > { %317 = vst [vmem:[%s208_s4 + $0x8] sm:$0xff] %v308_v16  ;;  %319 = vst [vmem:[%s208_s4 + $0x18] sm:$0xff] %v314_v17 }
  0xee PF: > { %s13_s14 = sadd.s32 1, %s476_s14   ;;  %s549_s12 = smov %s472_s13 }
  0xef   : > { %p10_p5 = scmp.ge.s32.totalorder %s13_s14, 4   ;;  %s550_s13 = smov %s552_s15 }
  0xf1   :  { %12 = sbr.rel (!%p10_p5) target bundleno = 2 (0x2), region = 62 }

</bundles_post_ra>
